<compile_context>
chip_gen: v7x
topology: tpu7x:2x2x1
jax: 0.10.0
libtpu: 0.0.40
codegen_flags: <defaults>
</compile_context>

<pallas_src>
import functools
import math

import jax
import jax.numpy as jnp
from jax.experimental import pallas as pl
from jax.experimental.pallas import tpu as pltpu


_VMEM_LIMIT = 48 * 1024 * 1024   # > default scoped limit on all gens, < physical


def _round_up(x, m):
    return (x + m - 1) // m * m


# ----------------------------- Pallas kernels --------------------------------

def _mm_bias_act_kernel(x_ref, w_ref, b_ref, o_ref, *, relu):
    # bf16 x bf16 -> f32 accumulate on the MXU; bias + ReLU in f32; cast on store.
    acc = jnp.dot(x_ref[...], w_ref[...], preferred_element_type=jnp.float32)
    acc = acc + b_ref[...]
    if relu:
        acc = jnp.maximum(acc, 0.0)
    o_ref[...] = acc.astype(o_ref.dtype)


def pallas_matmul_bias_relu(x, w, b, *, out_dtype=jnp.bfloat16, tm_max=512):
    """act = ReLU(x @ w + b), tiled over M (grid axis 'parallel')."""
    M, K = x.shape
    K2, N = w.shape
    assert K == K2, (K, K2)
    b = b.reshape(1, N).astype(jnp.float32)

    tm = min(tm_max, _round_up(M, 8))
    Mp = _round_up(M, tm)
    if Mp != M:
        x = jnp.pad(x, ((0, Mp - M), (0, 0)))

    out = pl.pallas_call(
        functools.partial(_mm_bias_act_kernel, relu=True),
        out_shape=jax.ShapeDtypeStruct((Mp, N), out_dtype),
        grid=(Mp // tm,),
        in_specs=[
            pl.BlockSpec((tm, K), lambda i: (i, 0)),
            pl.BlockSpec((K, N), lambda i: (0, 0)),
            pl.BlockSpec((1, N), lambda i: (0, 0)),
        ],
        out_specs=pl.BlockSpec((tm, N), lambda i: (i, 0)),
        compiler_params=pltpu.CompilerParams(
            dimension_semantics=("parallel",),
            vmem_limit_bytes=_VMEM_LIMIT),
    )(x, w, b)
    return out[:M] if Mp != M else out


def _head_kernel(flat_ref, fcw_ref, fcb_ref, hw_ref, hb_ref,
                 feat_ref, heads_ref, acc_ref):
    # Fused head: feat = ReLU(flat @ fc_w + fc_b)   (K-tiled, f32 accumulator)
    #             heads = feat @ [critic_w | dist_w/temp] + [critic_b | dist_b/temp]
    k = pl.program_id(1)

    @pl.when(k == 0)
    def _():
        acc_ref[...] = jnp.zeros_like(acc_ref)

    acc_ref[...] += jnp.dot(flat_ref[...], fcw_ref[...],
                            preferred_element_type=jnp.float32)

    @pl.when(k == pl.num_programs(1) - 1)
    def _():
        feat = jnp.maximum(acc_ref[...] + fcb_ref[...], 0.0)       # f32
        feat_ref[...] = feat
        heads = jnp.dot(feat.astype(jnp.bfloat16), hw_ref[...],
                        preferred_element_type=jnp.float32) + hb_ref[...]
        heads_ref[...] = heads


def pallas_fused_head(flat, fc_w, fc_b, heads_w, heads_b, *,
                      tm_max=512, tk_max=2048):
    """One kernel for fc(512)+ReLU, critic(1) and dist(n_action) heads.

    Returns (feat, heads) where heads[:, :1] is the value and heads[:, 1:] are
    the (already temperature-scaled) logits.
    """
    M, K = flat.shape
    K2, F = fc_w.shape
    assert K == K2, (K, K2)
    H = heads_w.shape[1]
    fc_b = fc_b.reshape(1, F).astype(jnp.float32)
    heads_b = heads_b.reshape(1, H).astype(jnp.float32)

    tm = min(tm_max, _round_up(M, 8))
    Mp = _round_up(M, tm)
    if K <= tk_max:                     # single K block (toy flat_dim = 512)
        tk, Kp = K, K
    else:                               # production flat_dim = 27648: stream K
        tk = tk_max
        Kp = _round_up(K, tk)
    if Mp != M or Kp != K:
        flat = jnp.pad(flat, ((0, Mp - M), (0, Kp - K)))
    if Kp != K:
        fc_w = jnp.pad(fc_w, ((0, Kp - K), (0, 0)))

    feat, heads = pl.pallas_call(
        _head_kernel,
        out_shape=(jax.ShapeDtypeStruct((Mp, F), jnp.float32),
                   jax.ShapeDtypeStruct((Mp, H), jnp.float32)),
        grid=(Mp // tm, Kp // tk),
        in_specs=[
            pl.BlockSpec((tm, tk), lambda i, k: (i, k)),
            pl.BlockSpec((tk, F), lambda i, k: (k, 0)),
            pl.BlockSpec((1, F), lambda i, k: (0, 0)),
            pl.BlockSpec((F, H), lambda i, k: (0, 0)),
            pl.BlockSpec((1, H), lambda i, k: (0, 0)),
        ],
        out_specs=(pl.BlockSpec((tm, F), lambda i, k: (i, 0)),
                   pl.BlockSpec((tm, H), lambda i, k: (i, 0))),
        scratch_shapes=[pltpu.VMEM((tm, F), jnp.float32)],
        compiler_params=pltpu.CompilerParams(
            dimension_semantics=("parallel", "arbitrary"),
            vmem_limit_bytes=_VMEM_LIMIT),
    )(flat, fc_w, fc_b, heads_w, heads_b)
    return feat[:M], heads[:M]


# ------------------------------- JAX glue ------------------------------------

def im2col(x_nhwc, kh, kw, stride):
    """Extract valid conv patches. Returns (B*oh*ow, kh*kw*C) with (i, j, c)
    ordering of the patch axis, plus output spatial dims."""
    B, H, W, C = x_nhwc.shape
    oh = (H - kh) // stride + 1
    ow = (W - kw) // stride + 1
    patches = []
    for i in range(kh):
        for j in range(kw):
            patches.append(
                x_nhwc[:, i:i + stride * oh:stride, j:j + stride * ow:stride, :])
    cols = jnp.concatenate(patches, axis=-1)           # (B, oh, ow, kh*kw*C)
    return cols.reshape(B * oh * ow, kh * kw * C), (B, oh, ow)


def conv_weight_to_mat(w_oihw):
    """PyTorch conv weight (Cout, Cin, kh, kw) -> (kh*kw*Cin, Cout) matching
    the im2col (i, j, c) patch ordering above."""
    cout, cin, kh, kw = w_oihw.shape
    return jnp.transpose(w_oihw, (2, 3, 1, 0)).reshape(kh * kw * cin, cout)


def orthogonal_init(key, shape, gain=1.0):
    """Deterministic orthogonal init matching nn.init.orthogonal_ semantics."""
    rows = shape[0]
    cols = math.prod(shape[1:])
    n, m = (rows, cols) if rows >= cols else (cols, rows)
    a = jax.random.normal(key, (n, m), dtype=jnp.float32)
    q, r = jnp.linalg.qr(a)
    q = q * jnp.sign(jnp.diagonal(r))
    if rows < cols:
        q = q.T
    return (gain * q[:rows, :cols]).reshape(shape)


def init_policy_params(key, n_channel, n_action, spatial):
    """PyTorch-layout parameters for CNNBase + critic + dist."""
    relu_gain = math.sqrt(2.0)  # nn.init.calculate_gain('relu')
    ks = jax.random.split(key, 6)

    h1 = (spatial - 8) // 4 + 1
    h2 = (h1 - 4) // 2 + 1
    h3 = (h2 - 3) // 1 + 1
    flat_dim = 32 * h3 * h3  # NOTE: module hardcodes 27648 (220x316 inputs);
                             # derived here for the small synthetic spatial size.

    return {
        "conv1_w": orthogonal_init(ks[0], (32, n_channel, 8, 8), relu_gain),
        "conv1_b": jnp.zeros((32,), jnp.float32),
        "conv2_w": orthogonal_init(ks[1], (64, 32, 4, 4), relu_gain),
        "conv2_b": jnp.zeros((64,), jnp.float32),
        "conv3_w": orthogonal_init(ks[2], (32, 64, 3, 3), relu_gain),
        "conv3_b": jnp.zeros((32,), jnp.float32),
        "fc_w": orthogonal_init(ks[3], (512, flat_dim), relu_gain),   # (out, in)
        "fc_b": jnp.zeros((512,), jnp.float32),
        "critic_w": orthogonal_init(ks[4], (1, 512), 1.0),
        "critic_b": jnp.zeros((1,), jnp.float32),
        "dist_w": orthogonal_init(ks[5], (n_action, 512), 0.01),
        "dist_b": jnp.zeros((n_action,), jnp.float32),
    }


def prepare_params(params, spatial, temp=1.0):
    """One-time weight prep: (K,N) layouts, fold 1/255 into conv1, NHWC-permute
    the fc weight (so flatten needs no transpose), concat critic+dist heads with
    1/temp folded in, cast matmul weights to bf16 (biases stay f32)."""
    h1 = (spatial - 8) // 4 + 1
    h2 = (h1 - 4) // 2 + 1
    h3 = (h2 - 3) // 1 + 1
    flat_dim = 32 * h3 * h3
    bf16, f32 = jnp.bfloat16, jnp.float32

    w1 = conv_weight_to_mat(params["conv1_w"]) * (1.0 / 255.0)   # fold inputs/255
    w2 = conv_weight_to_mat(params["conv2_w"])
    w3 = conv_weight_to_mat(params["conv3_w"])

    # fc weight: PyTorch (512, flat_NCHW) -> NHWC-ordered (flat_NHWC, 512)
    fc_w = params["fc_w"].reshape(512, 32, h3, h3)
    fc_w = jnp.transpose(fc_w, (2, 3, 1, 0)).reshape(flat_dim, 512)

    inv_t = 1.0 / float(temp)
    heads_w = jnp.concatenate(
        [params["critic_w"].T, params["dist_w"].T * inv_t], axis=1)   # (512, 1+A)
    heads_b = jnp.concatenate(
        [params["critic_b"], params["dist_b"] * inv_t], axis=0)       # (1+A,)

    return {
        "w1": w1.astype(bf16), "b1": params["conv1_b"].astype(f32),
        "w2": w2.astype(bf16), "b2": params["conv2_b"].astype(f32),
        "w3": w3.astype(bf16), "b3": params["conv3_b"].astype(f32),
        "fc_w": fc_w.astype(bf16), "fc_b": params["fc_b"].astype(f32),
        "heads_w": heads_w.astype(bf16), "heads_b": heads_b.astype(f32),
    }


def policy_forward(kp, inputs_nchw, states, masks):
    """Equivalent of Policy.act()'s deterministic compute path (no GRU):
    returns (value, actor_features, states, dist_logits)."""
    # NCHW -> NHWC, bf16 (pixel values 0..255 are exact in bf16; /255 is folded
    # into the conv1 weights).
    x = jnp.transpose(inputs_nchw.astype(jnp.bfloat16), (0, 2, 3, 1))

    # conv1 + ReLU
    cols, (B, oh, ow) = im2col(x, 8, 8, 4)
    h = pallas_matmul_bias_relu(cols, kp["w1"], kp["b1"]).reshape(B, oh, ow, 32)

    # conv2 + ReLU
    cols, (B, oh, ow) = im2col(h, 4, 4, 2)
    h = pallas_matmul_bias_relu(cols, kp["w2"], kp["b2"]).reshape(B, oh, ow, 64)

    # conv3 + ReLU
    cols, (B, oh, ow) = im2col(h, 3, 3, 1)
    h = pallas_matmul_bias_relu(cols, kp["w3"], kp["b3"]).reshape(B, oh, ow, 32)

    # NHWC flatten (fc weight rows were permuted at init to match PyTorch's
    # NCHW x.view(B, -1) semantics exactly -- no runtime transpose).
    flat = h.reshape(B, -1)

    # Fused head: fc(512)+ReLU, critic(1), dist(n_action)/temp in one kernel.
    feat, heads = pallas_fused_head(flat, kp["fc_w"], kp["fc_b"],
                                    kp["heads_w"], kp["heads_b"])
    value = heads[:, :1]
    # TODO(synk): Categorical class source not provided; assumed Linear + /temp.
    logits = heads[:, 1:]

    # No GRU (recurrent_policy=False): states pass through unchanged; masks unused.
    return value, feat, states, logits


# --------------------------------- main --------------------------------------

if __name__ == "__main__":
    key = jax.random.PRNGKey(0)
    k_param, k_in = jax.random.split(key)

    B, C, S = 2, 4, 64          # small, conv-stack-consistent spatial size
    n_action = 6
    temp = 1.0

    params = init_policy_params(k_param, C, n_action, S)
    kparams = prepare_params(params, S, temp=temp)

    inputs = jax.random.uniform(k_in, (B, C, S, S), jnp.float32,
                                minval=0.0, maxval=255.0)
    states = jnp.zeros((B, 1), jnp.float32)   # state_size == 1 (no GRU)
    masks = jnp.ones((B, 1), jnp.float32)

    fwd = jax.jit(policy_forward)
    value, actor_features, states_out, logits = fwd(kparams, inputs, states, masks)
    jax.block_until_ready((value, actor_features, states_out, logits))

    assert value.shape == (B, 1)
    assert actor_features.shape == (B, 512)
    assert states_out.shape == (B, 1)
    assert logits.shape == (B, n_action)

    print("KERNEL_OK")
</pallas_src>

<mosaic_0001>
module attributes {stable_mosaic.version = 11 : i64} {
  func.func @_mm_bias_act_kernel(%arg0: i32, %arg1: memref<456x256xbf16, #tpu.memory_space<vmem>>, %arg2: memref<256x32xbf16, #tpu.memory_space<vmem>>, %arg3: memref<1x32xf32, #tpu.memory_space<vmem>>, %arg4: memref<456x32xbf16, #tpu.memory_space<vmem>>) attributes {dimension_semantics = [#tpu.dimension_semantics<parallel>], iteration_bounds = array<i64: 1>, scalar_prefetch = 0 : i64, scratch_operands = 0 : i64, tpu.core_type = #tpu.core_type<tc>, window_params = [{transform_indices = @transform_0, window_bounds = array<i64: 456, 256>}, {pipeline_mode = #tpu.pipeline_mode<synchronous>, transform_indices = @transform_1, window_bounds = array<i64: 256, 32>}, {pipeline_mode = #tpu.pipeline_mode<synchronous>, transform_indices = @transform_2, window_bounds = array<i64: 1, 32>}, {transform_indices = @transform_3, window_bounds = array<i64: 456, 32>}]} {
    %c0 = arith.constant 0 : index
    %c0_0 = arith.constant 0 : index
    %0 = vector.load %arg1[%c0, %c0_0] : memref<456x256xbf16, #tpu.memory_space<vmem>>, vector<456x256xbf16>
    %c0_1 = arith.constant 0 : index
    %c0_2 = arith.constant 0 : index
    %1 = vector.load %arg2[%c0_1, %c0_2] : memref<256x32xbf16, #tpu.memory_space<vmem>>, vector<256x32xbf16>
    %cst = arith.constant dense<0.000000e+00> : vector<456x32xf32>
    %2 = tpu.matmul %0, %1, %cst {dimension_numbers = #tpu.dot_dimension_numbers<[1], [0], [0], [1], [0, 0, 1, 1], [], []>} : vector<456x256xbf16>, vector<256x32xbf16>, vector<456x32xf32> -> vector<456x32xf32>
    %c0_3 = arith.constant 0 : index
    %c0_4 = arith.constant 0 : index
    %3 = vector.load %arg3[%c0_3, %c0_4] : memref<1x32xf32, #tpu.memory_space<vmem>>, vector<1x32xf32>
    %4 = vector.broadcast %3 : vector<1x32xf32> to vector<456x32xf32>
    %5 = arith.addf %2, %4 : vector<456x32xf32>
    %cst_5 = arith.constant 0.000000e+00 : f32
    %6 = vector.broadcast %cst_5 : f32 to vector<456x32xf32>
    %7 = arith.maximumf %5, %6 : vector<456x32xf32>
    %8 = arith.truncf %7 : vector<456x32xf32> to vector<456x32xbf16>
    %c0_6 = arith.constant 0 : index
    %c0_7 = arith.constant 0 : index
    %9 = vector.load %arg4[%c0_6, %c0_7] : memref<456x32xbf16, #tpu.memory_space<vmem>>, vector<456x32xbf16>
    tpu.vector_store %arg4[%c0_6, %c0_7], %8 {strides = array<i32>} : memref<456x32xbf16, #tpu.memory_space<vmem>>, vector<456x32xbf16>,
    return
  }
  func.func @transform_0(%arg0: i32) -> (i32, i32) {
    %c0_i32 = arith.constant 0 : i32
    %c0_i32_0 = arith.constant 0 : i32
    return %arg0, %c0_i32 : i32, i32
  }
  func.func @transform_1(%arg0: i32) -> (i32, i32) {
    %c0_i32 = arith.constant 0 : i32
    %c0_i32_0 = arith.constant 0 : i32
    %c0_i32_1 = arith.constant 0 : i32
    return %c0_i32, %c0_i32_0 : i32, i32
  }
  func.func @transform_2(%arg0: i32) -> (i32, i32) {
    %c0_i32 = arith.constant 0 : i32
    %c0_i32_0 = arith.constant 0 : i32
    %c0_i32_1 = arith.constant 0 : i32
    return %c0_i32, %c0_i32_0 : i32, i32
  }
  func.func @transform_3(%arg0: i32) -> (i32, i32) {
    %c0_i32 = arith.constant 0 : i32
    %c0_i32_0 = arith.constant 0 : i32
    return %arg0, %c0_i32 : i32, i32
  }
}

module attributes {stable_mosaic.version = 11 : i64} {
  func.func @_mm_bias_act_kernel(%arg0: i32, %arg1: memref<72x512xbf16, #tpu.memory_space<vmem>>, %arg2: memref<512x64xbf16, #tpu.memory_space<vmem>>, %arg3: memref<1x64xf32, #tpu.memory_space<vmem>>, %arg4: memref<72x64xbf16, #tpu.memory_space<vmem>>) attributes {dimension_semantics = [#tpu.dimension_semantics<parallel>], iteration_bounds = array<i64: 1>, scalar_prefetch = 0 : i64, scratch_operands = 0 : i64, tpu.core_type = #tpu.core_type<tc>, window_params = [{transform_indices = @transform_0, window_bounds = array<i64: 72, 512>}, {pipeline_mode = #tpu.pipeline_mode<synchronous>, transform_indices = @transform_1, window_bounds = array<i64: 512, 64>}, {pipeline_mode = #tpu.pipeline_mode<synchronous>, transform_indices = @transform_2, window_bounds = array<i64: 1, 64>}, {transform_indices = @transform_3, window_bounds = array<i64: 72, 64>}]} {
    %c0 = arith.constant 0 : index
    %c0_0 = arith.constant 0 : index
    %0 = vector.load %arg1[%c0, %c0_0] : memref<72x512xbf16, #tpu.memory_space<vmem>>, vector<72x512xbf16>
    %c0_1 = arith.constant 0 : index
    %c0_2 = arith.constant 0 : index
    %1 = vector.load %arg2[%c0_1, %c0_2] : memref<512x64xbf16, #tpu.memory_space<vmem>>, vector<512x64xbf16>
    %cst = arith.constant dense<0.000000e+00> : vector<72x64xf32>
    %2 = tpu.matmul %0, %1, %cst {dimension_numbers = #tpu.dot_dimension_numbers<[1], [0], [0], [1], [0, 0, 1, 1], [], []>} : vector<72x512xbf16>, vector<512x64xbf16>, vector<72x64xf32> -> vector<72x64xf32>
    %c0_3 = arith.constant 0 : index
    %c0_4 = arith.constant 0 : index
    %3 = vector.load %arg3[%c0_3, %c0_4] : memref<1x64xf32, #tpu.memory_space<vmem>>, vector<1x64xf32>
    %4 = vector.broadcast %3 : vector<1x64xf32> to vector<72x64xf32>
    %5 = arith.addf %2, %4 : vector<72x64xf32>
    %cst_5 = arith.constant 0.000000e+00 : f32
    %6 = vector.broadcast %cst_5 : f32 to vector<72x64xf32>
    %7 = arith.maximumf %5, %6 : vector<72x64xf32>
    %8 = arith.truncf %7 : vector<72x64xf32> to vector<72x64xbf16>
    %c0_6 = arith.constant 0 : index
    %c0_7 = arith.constant 0 : index
    %9 = vector.load %arg4[%c0_6, %c0_7] : memref<72x64xbf16, #tpu.memory_space<vmem>>, vector<72x64xbf16>
    tpu.vector_store %arg4[%c0_6, %c0_7], %8 {strides = array<i32>} : memref<72x64xbf16, #tpu.memory_space<vmem>>, vector<72x64xbf16>,
    return
  }
  func.func @transform_0(%arg0: i32) -> (i32, i32) {
    %c0_i32 = arith.constant 0 : i32
    %c0_i32_0 = arith.constant 0 : i32
    return %arg0, %c0_i32 : i32, i32
  }
  func.func @transform_1(%arg0: i32) -> (i32, i32) {
    %c0_i32 = arith.constant 0 : i32
    %c0_i32_0 = arith.constant 0 : i32
    %c0_i32_1 = arith.constant 0 : i32
    return %c0_i32, %c0_i32_0 : i32, i32
  }
  func.func @transform_2(%arg0: i32) -> (i32, i32) {
    %c0_i32 = arith.constant 0 : i32
    %c0_i32_0 = arith.constant 0 : i32
    %c0_i32_1 = arith.constant 0 : i32
    return %c0_i32, %c0_i32_0 : i32, i32
  }
  func.func @transform_3(%arg0: i32) -> (i32, i32) {
    %c0_i32 = arith.constant 0 : i32
    %c0_i32_0 = arith.constant 0 : i32
    return %arg0, %c0_i32 : i32, i32
  }
}

module attributes {stable_mosaic.version = 11 : i64} {
  func.func @_mm_bias_act_kernel(%arg0: i32, %arg1: memref<32x576xbf16, #tpu.memory_space<vmem>>, %arg2: memref<576x32xbf16, #tpu.memory_space<vmem>>, %arg3: memref<1x32xf32, #tpu.memory_space<vmem>>, %arg4: memref<32x32xbf16, #tpu.memory_space<vmem>>) attributes {dimension_semantics = [#tpu.dimension_semantics<parallel>], iteration_bounds = array<i64: 1>, scalar_prefetch = 0 : i64, scratch_operands = 0 : i64, tpu.core_type = #tpu.core_type<tc>, window_params = [{transform_indices = @transform_0, window_bounds = array<i64: 32, 576>}, {pipeline_mode = #tpu.pipeline_mode<synchronous>, transform_indices = @transform_1, window_bounds = array<i64: 576, 32>}, {pipeline_mode = #tpu.pipeline_mode<synchronous>, transform_indices = @transform_2, window_bounds = array<i64: 1, 32>}, {transform_indices = @transform_3, window_bounds = array<i64: 32, 32>}]} {
    %c0 = arith.constant 0 : index
    %c0_0 = arith.constant 0 : index
    %0 = vector.load %arg1[%c0, %c0_0] : memref<32x576xbf16, #tpu.memory_space<vmem>>, vector<32x576xbf16>
    %c0_1 = arith.constant 0 : index
    %c0_2 = arith.constant 0 : index
    %1 = vector.load %arg2[%c0_1, %c0_2] : memref<576x32xbf16, #tpu.memory_space<vmem>>, vector<576x32xbf16>
    %cst = arith.constant dense<0.000000e+00> : vector<32x32xf32>
    %2 = tpu.matmul %0, %1, %cst {dimension_numbers = #tpu.dot_dimension_numbers<[1], [0], [0], [1], [0, 0, 1, 1], [], []>} : vector<32x576xbf16>, vector<576x32xbf16>, vector<32x32xf32> -> vector<32x32xf32>
    %c0_3 = arith.constant 0 : index
    %c0_4 = arith.constant 0 : index
    %3 = vector.load %arg3[%c0_3, %c0_4] : memref<1x32xf32, #tpu.memory_space<vmem>>, vector<1x32xf32>
    %4 = vector.broadcast %3 : vector<1x32xf32> to vector<32x32xf32>
    %5 = arith.addf %2, %4 : vector<32x32xf32>
    %cst_5 = arith.constant 0.000000e+00 : f32
    %6 = vector.broadcast %cst_5 : f32 to vector<32x32xf32>
    %7 = arith.maximumf %5, %6 : vector<32x32xf32>
    %8 = arith.truncf %7 : vector<32x32xf32> to vector<32x32xbf16>
    %c0_6 = arith.constant 0 : index
    %c0_7 = arith.constant 0 : index
    %9 = vector.load %arg4[%c0_6, %c0_7] : memref<32x32xbf16, #tpu.memory_space<vmem>>, vector<32x32xbf16>
    tpu.vector_store %arg4[%c0_6, %c0_7], %8 {strides = array<i32>} : memref<32x32xbf16, #tpu.memory_space<vmem>>, vector<32x32xbf16>,
    return
  }
  func.func @transform_0(%arg0: i32) -> (i32, i32) {
    %c0_i32 = arith.constant 0 : i32
    %c0_i32_0 = arith.constant 0 : i32
    return %arg0, %c0_i32 : i32, i32
  }
  func.func @transform_1(%arg0: i32) -> (i32, i32) {
    %c0_i32 = arith.constant 0 : i32
    %c0_i32_0 = arith.constant 0 : i32
    %c0_i32_1 = arith.constant 0 : i32
    return %c0_i32, %c0_i32_0 : i32, i32
  }
  func.func @transform_2(%arg0: i32) -> (i32, i32) {
    %c0_i32 = arith.constant 0 : i32
    %c0_i32_0 = arith.constant 0 : i32
    %c0_i32_1 = arith.constant 0 : i32
    return %c0_i32, %c0_i32_0 : i32, i32
  }
  func.func @transform_3(%arg0: i32) -> (i32, i32) {
    %c0_i32 = arith.constant 0 : i32
    %c0_i32_0 = arith.constant 0 : i32
    return %arg0, %c0_i32 : i32, i32
  }
}

module attributes {stable_mosaic.version = 11 : i64} {
  func.func @_head_kernel(%arg0: i32, %arg1: i32, %arg2: memref<8x512xbf16, #tpu.memory_space<vmem>>, %arg3: memref<512x512xbf16, #tpu.memory_space<vmem>>, %arg4: memref<1x512xf32, #tpu.memory_space<vmem>>, %arg5: memref<512x7xbf16, #tpu.memory_space<vmem>>, %arg6: memref<1x7xf32, #tpu.memory_space<vmem>>, %arg7: memref<8x512xf32, #tpu.memory_space<vmem>>, %arg8: memref<8x7xf32, #tpu.memory_space<vmem>>, %arg9: memref<8x512xf32, #tpu.memory_space<vmem>>) attributes {dimension_semantics = [#tpu.dimension_semantics<parallel>, #tpu.dimension_semantics<arbitrary>], iteration_bounds = array<i64: 1, 1>, scalar_prefetch = 0 : i64, scratch_operands = 1 : i64, tpu.core_type = #tpu.core_type<tc>, window_params = [{transform_indices = @transform_0, window_bounds = array<i64: 8, 512>}, {transform_indices = @transform_1, window_bounds = array<i64: 512, 512>}, {pipeline_mode = #tpu.pipeline_mode<synchronous>, transform_indices = @transform_2, window_bounds = array<i64: 1, 512>}, {pipeline_mode = #tpu.pipeline_mode<synchronous>, transform_indices = @transform_3, window_bounds = array<i64: 512, 7>}, {pipeline_mode = #tpu.pipeline_mode<synchronous>, transform_indices = @transform_4, window_bounds = array<i64: 1, 7>}, {transform_indices = @transform_5, window_bounds = array<i64: 8, 512>}, {transform_indices = @transform_6, window_bounds = array<i64: 8, 7>}]} {
    %c0_i32 = arith.constant 0 : i32
    %0 = arith.cmpi eq, %arg1, %c0_i32 : i32
    %1 = arith.extui %0 : i1 to i32
    %c0_i32_0 = arith.constant 0 : i32
    %2 = arith.cmpi ne, %1, %c0_i32_0 : i32
    scf.if %2 {
      %cst_10 = arith.constant 0.000000e+00 : f32
      %12 = vector.broadcast %cst_10 : f32 to vector<8x512xf32>
      %c0_11 = arith.constant 0 : index
      %c0_12 = arith.constant 0 : index
      %13 = vector.load %arg9[%c0_11, %c0_12] : memref<8x512xf32, #tpu.memory_space<vmem>>, vector<8x512xf32>
      tpu.vector_store %arg9[%c0_11, %c0_12], %12 {strides = array<i32>} : memref<8x512xf32, #tpu.memory_space<vmem>>, vector<8x512xf32>,
    } else {
    }
    %c0 = arith.constant 0 : index
    %c0_1 = arith.constant 0 : index
    %3 = vector.load %arg9[%c0, %c0_1] : memref<8x512xf32, #tpu.memory_space<vmem>>, vector<8x512xf32>
    %c0_2 = arith.constant 0 : index
    %c0_3 = arith.constant 0 : index
    %4 = vector.load %arg2[%c0_2, %c0_3] : memref<8x512xbf16, #tpu.memory_space<vmem>>, vector<8x512xbf16>
    %c0_4 = arith.constant 0 : index
    %c0_5 = arith.constant 0 : index
    %5 = vector.load %arg3[%c0_4, %c0_5] : memref<512x512xbf16, #tpu.memory_space<vmem>>, vector<512x512xbf16>
    %cst = arith.constant dense<0.000000e+00> : vector<8x512xf32>
    %6 = tpu.matmul %4, %5, %cst {dimension_numbers = #tpu.dot_dimension_numbers<[1], [0], [0], [1], [0, 0, 1, 1], [], []>} : vector<8x512xbf16>, vector<512x512xbf16>, vector<8x512xf32> -> vector<8x512xf32>
    %7 = arith.addf %3, %6 : vector<8x512xf32>
    %c0_6 = arith.constant 0 : index
    %c0_7 = arith.constant 0 : index
    %8 = vector.load %arg9[%c0_6, %c0_7] : memref<8x512xf32, #tpu.memory_space<vmem>>, vector<8x512xf32>
    tpu.vector_store %arg9[%c0_6, %c0_7], %7 {strides = array<i32>} : memref<8x512xf32, #tpu.memory_space<vmem>>, vector<8x512xf32>,
    %c0_i32_8 = arith.constant 0 : i32
    %9 = arith.cmpi eq, %arg1, %c0_i32_8 : i32
    %10 = arith.extui %9 : i1 to i32
    %c0_i32_9 = arith.constant 0 : i32
    %11 = arith.cmpi ne, %10, %c0_i32_9 : i32
    scf.if %11 {
      %c0_10 = arith.constant 0 : index
      %c0_11 = arith.constant 0 : index
      %12 = vector.load %arg9[%c0_10, %c0_11] : memref<8x512xf32, #tpu.memory_space<vmem>>, vector<8x512xf32>
      %c0_12 = arith.constant 0 : index
      %c0_13 = arith.constant 0 : index
      %13 = vector.load %arg4[%c0_12, %c0_13] : memref<1x512xf32, #tpu.memory_space<vmem>>, vector<1x512xf32>
      %14 = vector.broadcast %13 : vector<1x512xf32> to vector<8x512xf32>
      %15 = arith.addf %12, %14 : vector<8x512xf32>
      %cst_14 = arith.constant 0.000000e+00 : f32
      %16 = vector.broadcast %cst_14 : f32 to vector<8x512xf32>
      %17 = arith.maximumf %15, %16 : vector<8x512xf32>
      %c0_15 = arith.constant 0 : index
      %c0_16 = arith.constant 0 : index
      %18 = vector.load %arg7[%c0_15, %c0_16] : memref<8x512xf32, #tpu.memory_space<vmem>>, vector<8x512xf32>
      tpu.vector_store %arg7[%c0_15, %c0_16], %17 {strides = array<i32>} : memref<8x512xf32, #tpu.memory_space<vmem>>, vector<8x512xf32>,
      %19 = arith.truncf %17 : vector<8x512xf32> to vector<8x512xbf16>
      %c0_17 = arith.constant 0 : index
      %c0_18 = arith.constant 0 : index
      %20 = vector.load %arg5[%c0_17, %c0_18] : memref<512x7xbf16, #tpu.memory_space<vmem>>, vector<512x7xbf16>
      %cst_19 = arith.constant dense<0.000000e+00> : vector<8x7xf32>
      %21 = tpu.matmul %19, %20, %cst_19 {dimension_numbers = #tpu.dot_dimension_numbers<[1], [0], [0], [1], [0, 0, 1, 1], [], []>} : vector<8x512xbf16>, vector<512x7xbf16>, vector<8x7xf32> -> vector<8x7xf32>
      %c0_20 = arith.constant 0 : index
      %c0_21 = arith.constant 0 : index
      %22 = vector.load %arg6[%c0_20, %c0_21] : memref<1x7xf32, #tpu.memory_space<vmem>>, vector<1x7xf32>
      %23 = vector.broadcast %22 : vector<1x7xf32> to vector<8x7xf32>
      %24 = arith.addf %21, %23 : vector<8x7xf32>
      %c0_22 = arith.constant 0 : index
      %c0_23 = arith.constant 0 : index
      %25 = vector.load %arg8[%c0_22, %c0_23] : memref<8x7xf32, #tpu.memory_space<vmem>>, vector<8x7xf32>
      tpu.vector_store %arg8[%c0_22, %c0_23], %24 {strides = array<i32>} : memref<8x7xf32, #tpu.memory_space<vmem>>, vector<8x7xf32>,
    } else {
    }
    return
  }
  func.func @transform_0(%arg0: i32, %arg1: i32) -> (i32, i32) {
    %c0_i32 = arith.constant 0 : i32
    return %arg0, %arg1 : i32, i32
  }
  func.func @transform_1(%arg0: i32, %arg1: i32) -> (i32, i32) {
    %c0_i32 = arith.constant 0 : i32
    %c0_i32_0 = arith.constant 0 : i32
    return %arg1, %c0_i32 : i32, i32
  }
  func.func @transform_2(%arg0: i32, %arg1: i32) -> (i32, i32) {
    %c0_i32 = arith.constant 0 : i32
    %c0_i32_0 = arith.constant 0 : i32
    %c0_i32_1 = arith.constant 0 : i32
    return %c0_i32, %c0_i32_0 : i32, i32
  }
  func.func @transform_3(%arg0: i32, %arg1: i32) -> (i32, i32) {
    %c0_i32 = arith.constant 0 : i32
    %c0_i32_0 = arith.constant 0 : i32
    %c0_i32_1 = arith.constant 0 : i32
    return %c0_i32, %c0_i32_0 : i32, i32
  }
  func.func @transform_4(%arg0: i32, %arg1: i32) -> (i32, i32) {
    %c0_i32 = arith.constant 0 : i32
    %c0_i32_0 = arith.constant 0 : i32
    %c0_i32_1 = arith.constant 0 : i32
    return %c0_i32, %c0_i32_0 : i32, i32
  }
  func.func @transform_5(%arg0: i32, %arg1: i32) -> (i32, i32) {
    %c0_i32 = arith.constant 0 : i32
    %c0_i32_0 = arith.constant 0 : i32
    return %arg0, %c0_i32 : i32, i32
  }
  func.func @transform_6(%arg0: i32, %arg1: i32) -> (i32, i32) {
    %c0_i32 = arith.constant 0 : i32
    %c0_i32_0 = arith.constant 0 : i32
    return %arg0, %c0_i32 : i32, i32
  }
}

</mosaic_0001>

<bundles_post_ra>
// kernel: policy_forward.4
= control target key start
LH: loop header
LB: loop body
LE: loop exit
PB: predicated region body
PF: predicated region fallthrough
CT: control target
= control target key end

     0   :  { %v1430_v0 = vmov 0   ;;  %vm1044_vm0 = vcmask 257024   ;;  %s1992_s1 = inlined_call_operand.vmem [shape: bf16[256,32], index: 1, kind: input, shape index: {}]   ;;  %s1993_s0 = inlined_call_operand.vmem [shape: bf16[456,256], index: 0, kind: input, shape index: {}]   ;;  %s1994_s2 = inlined_call_operand.vmem [shape: f32[1,32], index: 2, kind: input, shape index: {}]   ;;  %s1995_s3 = inlined_call_operand.vmem [shape: bf16[456,32], index: 3, kind: output, shape index: {}]  }
   0x1   :  { %494 = vmatprep.subr.bf16.mxu0 %v1430_v0  ;;  %v1328_v1 = vld [vmem:[%s1992_s1] sm:$0xff]   ;;  %1295 = vmatprep.subr.bf16.mxu1 %v1430_v0  ;;  %v1329_v2 = vld [vmem:[%s1992_s1 + $0x8] sm:$0xff]   ;;  %v1330_v3 = vld [vmem:[%s1992_s1 + $0x10] sm:$0xff]  }
   0x2   :  { %495 = vmatpush1.bf16.msra.mxu0 %v1328_v1  ;;  %1311 = vmatpush1.bf16.msra.mxu1 %v1328_v1  ;;  %v1331_v4 = vld [vmem:[%s1992_s1 + $0x18] sm:$0xff]   ;;  %v1332_v5 = vld [vmem:[%s1992_s1 + $0x20] sm:$0xff]   ;;  %v1333_v7 = vld [vmem:[%s1992_s1 + $0x28] sm:$0xff]  }
   0x3   :  { %496 = vmatprep.subr.bf16.mxu0 %v1430_v0  ;;  %1296 = vmatprep.subr.bf16.mxu1 %v1430_v0  ;;  %v1346_v6 = vld [vmem:[%s1993_s0 + $0x4] ss:$8 sps:$4 sm:$0xff]   ;;  %v1349_v8 = vld [vmem:[%s1993_s0 + $0xf4] ss:$8 sps:$4 sm:$0xff]   ;;  %v1344_v19 = vld [vmem:[%s1993_s0] ss:$8 sps:$4 sm:$0xff]  }
   0x4   :  { %526 = vmatprep.mubr.bf16.mxu0 %v1346_v6  ;;  %646 = vmatprep.mubr.bf16.mxu1 %v1349_v8  ;;  %v1334_v9 = vld [vmem:[%s1992_s1 + $0x30] sm:$0xff]   ;;  %v1335_v10 = vld [vmem:[%s1992_s1 + $0x38] sm:$0xff]   ;;  %v1336_v11 = vld [vmem:[%s1992_s1 + $0x40] sm:$0xff]  }
   0x5   :  { %v1337_v12 = vld [vmem:[%s1992_s1 + $0x48] sm:$0xff]   ;;  %v1338_v13 = vld [vmem:[%s1992_s1 + $0x50] sm:$0xff]   ;;  %v1339_v14 = vld [vmem:[%s1992_s1 + $0x58] sm:$0xff]  }
   0x6   :  { %497 = vmatpush1.bf16.msra.mxu0 %v1329_v2  ;;  %1312 = vmatpush1.bf16.msra.mxu1 %v1329_v2  ;;  %v1340_v15 = vld [vmem:[%s1992_s1 + $0x60] sm:$0xff]   ;;  %v1341_v16 = vld [vmem:[%s1992_s1 + $0x68] sm:$0xff]   ;;  %v1342_v17 = vld [vmem:[%s1992_s1 + $0x70] sm:$0xff]  }
   0x7   :  { %498 = vmatprep.subr.bf16.mxu0 %v1430_v0  ;;  %1297 = vmatprep.subr.bf16.mxu1 %v1430_v0  ;;  %v1343_v18 = vld [vmem:[%s1992_s1 + $0x78] sm:$0xff]   ;;  %v1353_v22 = vld [vmem:[%s1993_s0 + $0x104] ss:$8 sps:$4 sm:$0xff]   ;;  %v1357_v24 = vld [vmem:[%s1993_s0 + $0x100] ss:$8 sps:$4 sm:$0xff]  }
   0x8   :  { %v1347_v20 = vld [vmem:[%s1993_s0 + $0xf0] ss:$8 sps:$4 sm:$0xff]   ;;  %v1350_v21 = vld [vmem:[%s1993_s0 + $0x14] ss:$8 sps:$4 sm:$0xff]   ;;  %v1355_v25 = vld [vmem:[%s1993_s0 + $0x24] ss:$8 sps:$4 sm:$0xff]  }
   0x9   :  { %v1352_v23 = vld [vmem:[%s1993_s0 + $0x10] ss:$8 sps:$4 sm:$0xff]   ;;  %v1359_v26 = vld [vmem:[%s1993_s0 + $0x114] ss:$8 sps:$4 sm:$0xff]   ;;  %v1358_v27 = vld [vmem:[%s1993_s0 + $0x20] ss:$8 sps:$4 sm:$0xff]  }
   0xa   :  { %499 = vmatpush1.bf16.msra.mxu0 %v1330_v3  ;;  %1313 = vmatpush1.bf16.msra.mxu1 %v1330_v3  ;;  %v1363_v28 = vld [vmem:[%s1993_s0 + $0x110] ss:$8 sps:$4 sm:$0xff]   ;;  %v1361_v29 = vld [vmem:[%s1993_s0 + $0x34] ss:$8 sps:$4 sm:$0xff]   ;;  %v1365_v30 = vld [vmem:[%s1993_s0 + $0x124] ss:$8 sps:$4 sm:$0xff]  }
   0xb   :  { %500 = vmatprep.subr.bf16.mxu0 %v1430_v0  ;;  %1298 = vmatprep.subr.bf16.mxu1 %v1430_v0  ;;  %v1364_v31 = vld [vmem:[%s1993_s0 + $0x30] ss:$8 sps:$4 sm:$0xff]   ;;  %v1369_v32 = vld [vmem:[%s1993_s0 + $0x120] ss:$8 sps:$4 sm:$0xff]   ;;  %v1367_v33 = vld [vmem:[%s1993_s0 + $0x44] ss:$8 sps:$4 sm:$0xff]  }
   0xc   :  { %v1371_v34 = vld [vmem:[%s1993_s0 + $0x134] ss:$8 sps:$4 sm:$0xff]   ;;  %v1370_v35 = vld [vmem:[%s1993_s0 + $0x40] ss:$8 sps:$4 sm:$0xff]   ;;  %v1375_v36 = vld [vmem:[%s1993_s0 + $0x130] ss:$8 sps:$4 sm:$0xff]  }
   0xd   :  { %v1373_v37 = vld [vmem:[%s1993_s0 + $0x54] ss:$8 sps:$4 sm:$0xff]   ;;  %v1377_v38 = vld [vmem:[%s1993_s0 + $0x144] ss:$8 sps:$4 sm:$0xff]   ;;  %v1376_v39 = vld [vmem:[%s1993_s0 + $0x50] ss:$8 sps:$4 sm:$0xff]  }
   0xe   :  { %501 = vmatpush1.bf16.msra.mxu0 %v1331_v4  ;;  %1314 = vmatpush1.bf16.msra.mxu1 %v1331_v4  ;;  %v1381_v40 = vld [vmem:[%s1993_s0 + $0x140] ss:$8 sps:$4 sm:$0xff]   ;;  %v1379_v41 = vld [vmem:[%s1993_s0 + $0x64] ss:$8 sps:$4 sm:$0xff]   ;;  %v1383_v42 = vld [vmem:[%s1993_s0 + $0x154] ss:$8 sps:$4 sm:$0xff]  }
   0xf   :  { %502 = vmatprep.subr.bf16.mxu0 %v1430_v0  ;;  %1299 = vmatprep.subr.bf16.mxu1 %v1430_v0  ;;  %v1382_v43 = vld [vmem:[%s1993_s0 + $0x60] ss:$8 sps:$4 sm:$0xff]   ;;  %v1387_v44 = vld [vmem:[%s1993_s0 + $0x150] ss:$8 sps:$4 sm:$0xff]   ;;  %v1385_v45 = vld [vmem:[%s1993_s0 + $0x74] ss:$8 sps:$4 sm:$0xff]  }
  0x10   :  { %v1389_v46 = vld [vmem:[%s1993_s0 + $0x164] ss:$8 sps:$4 sm:$0xff]   ;;  %v1388_v47 = vld [vmem:[%s1993_s0 + $0x70] ss:$8 sps:$4 sm:$0xff]   ;;  %v1393_v48 = vld [vmem:[%s1993_s0 + $0x160] ss:$8 sps:$4 sm:$0xff]  }
  0x11   :  { %v1391_v49 = vld [vmem:[%s1993_s0 + $0x84] ss:$8 sps:$4 sm:$0xff]   ;;  %v1395_v50 = vld [vmem:[%s1993_s0 + $0x174] ss:$8 sps:$4 sm:$0xff]   ;;  %v1394_v51 = vld [vmem:[%s1993_s0 + $0x80] ss:$8 sps:$4 sm:$0xff]  }
  0x12   :  { %503 = vmatpush1.bf16.msra.mxu0 %v1332_v5  ;;  %1315 = vmatpush1.bf16.msra.mxu1 %v1332_v5  ;;  %v1399_v52 = vld [vmem:[%s1993_s0 + $0x170] ss:$8 sps:$4 sm:$0xff]   ;;  %v1397_v53 = vld [vmem:[%s1993_s0 + $0x94] ss:$8 sps:$4 sm:$0xff]   ;;  %v1401_v54 = vld [vmem:[%s1993_s0 + $0x184] ss:$8 sps:$4 sm:$0xff]  }
  0x13   :  { %504 = vmatprep.subr.bf16.mxu0 %v1430_v0  ;;  %1300 = vmatprep.subr.bf16.mxu1 %v1430_v0  ;;  %v1400_v55 = vld [vmem:[%s1993_s0 + $0x90] ss:$8 sps:$4 sm:$0xff]   ;;  %v1405_v56 = vld [vmem:[%s1993_s0 + $0x180] ss:$8 sps:$4 sm:$0xff]   ;;  %v1403_v57 = vld [vmem:[%s1993_s0 + $0xa4] ss:$8 sps:$4 sm:$0xff]  }
  0x14   :  { %v1407_v58 = vld [vmem:[%s1993_s0 + $0x194] ss:$8 sps:$4 sm:$0xff]   ;;  %v1406_v59 = vld [vmem:[%s1993_s0 + $0xa0] ss:$8 sps:$4 sm:$0xff]   ;;  %v1411_v60 = vld [vmem:[%s1993_s0 + $0x190] ss:$8 sps:$4 sm:$0xff]  }
  0x15   :  { %v1409_v61 = vld [vmem:[%s1993_s0 + $0xb4] ss:$8 sps:$4 sm:$0xff]   ;;  %v1413_v62 = vld [vmem:[%s1993_s0 + $0x1a4] ss:$8 sps:$4 sm:$0xff]   ;;  %v1412_v63 = vld [vmem:[%s1993_s0 + $0xb0] ss:$8 sps:$4 sm:$0xff]  }
  0x16   :  { %505 = vmatpush1.bf16.msra.mxu0 %v1333_v7  ;;  %1316 = vmatpush1.bf16.msra.mxu1 %v1333_v7  ;;  %v1415_v1 = vld [vmem:[%s1993_s0 + $0xc4] ss:$8 sps:$4 sm:$0xff]   ;;  %v1419_v2 = vld [vmem:[%s1993_s0 + $0x1b4] ss:$8 sps:$4 sm:$0xff]   ;;  %v1418_v4 = vld [vmem:[%s1993_s0 + $0xc0] ss:$8 sps:$4 sm:$0xff]  }
  0x17   :  { %506 = vmatprep.subr.bf16.mxu0 %v1430_v0  ;;  %1301 = vmatprep.subr.bf16.mxu1 %v1430_v0  ;;  %v71_v3 = vld [vmem:[%s1993_s0 + $0x1c0] sm:$0xff]  ;;  %v1423_v5 = vld [vmem:[%s1993_s0 + $0x1b0] ss:$8 sps:$4 sm:$0xff]   ;;  %v1421_v6 = vld [vmem:[%s1993_s0 + $0xd4] ss:$8 sps:$4 sm:$0xff]  }
  0x18   :  { %v1164_v7 = vcombine.high %v71_v3, %v71_v3  ;;  %v1424_v8 = vld [vmem:[%s1993_s0 + $0xd0] ss:$8 sps:$4 sm:$0xff]  }
  0x1a   :  { %507 = vmatpush1.bf16.msra.mxu0 %v1334_v9  ;;  %1317 = vmatpush1.bf16.msra.mxu1 %v1334_v9  ;;  %v1163_v9 = vcombine.low %v71_v3, %v71_v3 }
  0x1b   :  { %508 = vmatprep.subr.bf16.mxu0 %v1430_v0  ;;  %1302 = vmatprep.subr.bf16.mxu1 %v1430_v0 }
  0x1e   :  { %509 = vmatpush1.bf16.msra.mxu0 %v1335_v10  ;;  %1318 = vmatpush1.bf16.msra.mxu1 %v1335_v10  ;;  %v1426_v10 = vld [vmem:[%s1993_s0 + $0xe4] ss:$8 sps:$4 sm:$0xff]  }
  0x1f   :  { %510 = vmatprep.subr.bf16.mxu0 %v1430_v0  ;;  %1303 = vmatprep.subr.bf16.mxu1 %v1430_v0 }
  0x22   :  { %511 = vmatpush1.bf16.msra.mxu0 %v1336_v11  ;;  %1319 = vmatpush1.bf16.msra.mxu1 %v1336_v11  ;;  %v1429_v11 = vld [vmem:[%s1993_s0 + $0xe0] ss:$8 sps:$4 sm:$0xff]  }
  0x23   :  { %512 = vmatprep.subr.bf16.mxu0 %v1430_v0  ;;  %1304 = vmatprep.subr.bf16.mxu1 %v1430_v0 }
  0x26   :  { %513 = vmatpush1.bf16.msra.mxu0 %v1337_v12  ;;  %1320 = vmatpush1.bf16.msra.mxu1 %v1337_v12  ;;  %v1705_v12 = vld [vmem:[%s1994_s2] ss:$0 sm:$0xff] }
  0x27   :  { %514 = vmatprep.subr.bf16.mxu0 %v1430_v0  ;;  %1305 = vmatprep.subr.bf16.mxu1 %v1430_v0 }
  0x2a   :  { %515 = vmatpush1.bf16.msra.mxu0 %v1338_v13  ;;  %1321 = vmatpush1.bf16.msra.mxu1 %v1338_v13 }
  0x2b   :  { %516 = vmatprep.subr.bf16.mxu0 %v1430_v0  ;;  %1306 = vmatprep.subr.bf16.mxu1 %v1430_v0 }
  0x2e   :  { %517 = vmatpush1.bf16.msra.mxu0 %v1339_v14  ;;  %1322 = vmatpush1.bf16.msra.mxu1 %v1339_v14 }
  0x2f   :  { %518 = vmatprep.subr.bf16.mxu0 %v1430_v0  ;;  %1307 = vmatprep.subr.bf16.mxu1 %v1430_v0 }
  0x32   :  { %519 = vmatpush1.bf16.msra.mxu0 %v1340_v15  ;;  %1323 = vmatpush1.bf16.msra.mxu1 %v1340_v15 }
  0x33   :  { %520 = vmatprep.subr.bf16.mxu0 %v1430_v0  ;;  %1308 = vmatprep.subr.bf16.mxu1 %v1430_v0 }
  0x36   :  { %521 = vmatpush1.bf16.msra.mxu0 %v1341_v16  ;;  %1324 = vmatpush1.bf16.msra.mxu1 %v1341_v16 }
  0x37   :  { %522 = vmatprep.subr.bf16.mxu0 %v1430_v0  ;;  %1309 = vmatprep.subr.bf16.mxu1 %v1430_v0 }
  0x3a   :  { %523 = vmatpush1.bf16.msra.mxu0 %v1342_v17  ;;  %1325 = vmatpush1.bf16.msra.mxu1 %v1342_v17 }
  0x3b   :  { %524 = vmatprep.subr.bf16.mxu0 %v1430_v0  ;;  %1310 = vmatprep.subr.bf16.mxu1 %v1430_v0  ;;  %v1417_v0 = vld [vmem:[%s1993_s0 + $0x1a0] ss:$8 sps:$4 sm:$0xff]  }
  0x3e   :  { %525 = vmatpush1.bf16.msra.mxu0 %v1343_v18  ;;  %1326 = vmatpush1.bf16.msra.mxu1 %v1343_v18 }
  0x41   :  { %527 = vmatmul.mubr.bf16.vlgmr.msra.gmra.mrb[0].mxu0 %v1344_v19  ;;  %647 = vmatmul.mubr.bf16.vlgmr.msra.gmra.mrb[0].mxu1 %v1347_v20 }
  0x42   :  { %534 = vmatprep.mubr.bf16.mxu0 %v1350_v21  ;;  %654 = vmatprep.mubr.bf16.mxu1 %v1353_v22 }
  0x49   :  { %535 = vmatmul.mubr.bf16.gmra.mrb[4].mxu0 %v1352_v23  ;;  %655 = vmatmul.mubr.bf16.gmra.mrb[4].mxu1 %v1357_v24 }
  0x4a   :  { %542 = vmatprep.mubr.bf16.mxu0 %v1355_v25  ;;  %662 = vmatprep.mubr.bf16.mxu1 %v1359_v26 }
  0x51   :  { %543 = vmatmul.mubr.bf16.gmra.mrb[8].mxu0 %v1358_v27  ;;  %663 = vmatmul.mubr.bf16.gmra.mrb[8].mxu1 %v1363_v28 }
  0x52   :  { %550 = vmatprep.mubr.bf16.mxu0 %v1361_v29  ;;  %670 = vmatprep.mubr.bf16.mxu1 %v1365_v30 }
  0x59   :  { %551 = vmatmul.mubr.bf16.gmra.mrb[12].mxu0 %v1364_v31  ;;  %671 = vmatmul.mubr.bf16.gmra.mrb[12].mxu1 %v1369_v32 }
  0x5a   :  { %558 = vmatprep.mubr.bf16.mxu0 %v1367_v33  ;;  %678 = vmatprep.mubr.bf16.mxu1 %v1371_v34 }
  0x61   :  { %559 = vmatmul.mubr.bf16.gmra.mrb[16].mxu0 %v1370_v35  ;;  %679 = vmatmul.mubr.bf16.gmra.mrb[16].mxu1 %v1375_v36 }
  0x62   :  { %566 = vmatprep.mubr.bf16.mxu0 %v1373_v37  ;;  %686 = vmatprep.mubr.bf16.mxu1 %v1377_v38 }
  0x69   :  { %567 = vmatmul.mubr.bf16.gmra.mrb[20].mxu0 %v1376_v39  ;;  %687 = vmatmul.mubr.bf16.gmra.mrb[20].mxu1 %v1381_v40 }
  0x6a   :  { %574 = vmatprep.mubr.bf16.mxu0 %v1379_v41  ;;  %694 = vmatprep.mubr.bf16.mxu1 %v1383_v42 }
  0x71   :  { %575 = vmatmul.mubr.bf16.gmra.mrb[24].mxu0 %v1382_v43  ;;  %695 = vmatmul.mubr.bf16.gmra.mrb[24].mxu1 %v1387_v44 }
  0x72   :  { %582 = vmatprep.mubr.bf16.mxu0 %v1385_v45  ;;  %702 = vmatprep.mubr.bf16.mxu1 %v1389_v46 }
  0x79   :  { %583 = vmatmul.mubr.bf16.gmra.mrb[28].mxu0 %v1388_v47  ;;  %703 = vmatmul.mubr.bf16.gmra.mrb[28].mxu1 %v1393_v48 }
  0x7a   :  { %590 = vmatprep.mubr.bf16.mxu0 %v1391_v49  ;;  %710 = vmatprep.mubr.bf16.mxu1 %v1395_v50 }
  0x81   :  { %591 = vmatmul.mubr.bf16.gmra.mrb[32].mxu0 %v1394_v51  ;;  %711 = vmatmul.mubr.bf16.gmra.mrb[32].mxu1 %v1399_v52 }
  0x82   :  { %598 = vmatprep.mubr.bf16.mxu0 %v1397_v53  ;;  %718 = vmatprep.mubr.bf16.mxu1 %v1401_v54 }
  0x89   :  { %599 = vmatmul.mubr.bf16.gmra.mrb[36].mxu0 %v1400_v55  ;;  %719 = vmatmul.mubr.bf16.gmra.mrb[36].mxu1 %v1405_v56 }
  0x8a   :  { %606 = vmatprep.mubr.bf16.mxu0 %v1403_v57  ;;  %726 = vmatprep.mubr.bf16.mxu1 %v1407_v58 }
  0x91   :  { %607 = vmatmul.mubr.bf16.gmra.mrb[40].mxu0 %v1406_v59  ;;  %727 = vmatmul.mubr.bf16.gmra.mrb[40].mxu1 %v1411_v60 }
  0x92   :  { %614 = vmatprep.mubr.bf16.mxu0 %v1409_v61  ;;  %734 = vmatprep.mubr.bf16.mxu1 %v1413_v62 }
  0x99   :  { %615 = vmatmul.mubr.bf16.gmra.mrb[44].mxu0 %v1412_v63  ;;  %735 = vmatmul.mubr.bf16.gmra.mrb[44].mxu1 %v1417_v0 }
  0x9a   :  { %622 = vmatprep.mubr.bf16.mxu0 %v1415_v1  ;;  %742 = vmatprep.mubr.bf16.mxu1 %v1419_v2 }
  0xa1   :  { %623 = vmatmul.mubr.bf16.gmra.mrb[48].mxu0 %v1418_v4  ;;  %743 = vmatmul.mubr.bf16.gmra.mrb[48].mxu1 %v1423_v5 }
  0xa2   :  { %630 = vmatprep.mubr.bf16.mxu0 %v1421_v6  ;;  %750 = vmatprep.mubr.bf16.mxu1 %v1164_v7 }
  0xa9   :  { %631 = vmatmul.mubr.bf16.gmra.mrb[52].mxu0 %v1424_v8  ;;  %751 = vmatmul.mubr.bf16.gmra.mrb[52].mxu1 %v1163_v9 }
  0xaa   :  { %638 = vmatprep.mubr.bf16.mxu0 %v1426_v10 }
  0xb1   :  { %639 = vmatmul.mubr.bf16.gmra.mrb[56].mxu0 %v1429_v11 }
 0x114   :  { %v528_v13 = vpop.f32.mrb[0].mxu0  ;;  %v648_v14 = vpop.f32.mrb[0].mxu1 }
 0x115   :  { %v529_v15 = vadd.f32 %v1705_v12, %v528_v13  ;;  %v530_v16 = vpop.f32.mrb[1].mxu0  ;;  %v649_v17 = vadd.f32 %v1705_v12, %v648_v14  ;;  %v650_v18 = vpop.f32.mrb[1].mxu1 }
 0x116   :  { %v531_v19 = vpop.f32.mrb[2].mxu0  ;;  %v651_v20 = vpop.f32.mrb[2].mxu1 }
 0x117   :  { %v758_v21 = vmax.f32 %v529_v15, 0.0  ;;  %v532_v22 = vadd.f32 %v1705_v12, %v531_v19  ;;  %v533_v23 = vpop.f32.mrb[3].mxu0  ;;  %v788_v24 = vmax.f32 %v649_v17, 0.0  ;;  %v652_v25 = vadd.f32 %v1705_v12, %v651_v20  ;;  %v653_v26 = vpop.f32.mrb[3].mxu1 }
 0x119   :  { %v1238_v27 = vpack.c.bf16 %v758_v21, %v758_v21  ;;  %v759_v28 = vmax.f32 %v532_v22, 0.0  ;;  %v1268_v29 = vpack.c.bf16 %v788_v24, %v788_v24  ;;  %v789_v30 = vmax.f32 %v652_v25, 0.0 }
 0x11b   :  { %1045 = vst.msk [vmem:[%s1995_s3] sm:$0xf] %vm1044_vm0, %v1238_v27  ;;  %v1239_v31 = vpack.c.bf16 %v759_v28, %v759_v28  ;;  %1075 = vst.msk [vmem:[%s1995_s3 + $0x78] sm:$0xf] %vm1044_vm0, %v1268_v29  ;;  %v1269_v32 = vpack.c.bf16 %v789_v30, %v789_v30 }
 0x11c   :  { %v536_v33 = vpop.f32.mrb[4].mxu0  ;;  %v656_v34 = vpop.f32.mrb[4].mxu1 }
 0x11d   :  { %1046 = vst.msk [vmem:[%s1995_s3 + $0x4] sm:$0xf] %vm1044_vm0, %v1239_v31  ;;  %v537_v35 = vadd.f32 %v1705_v12, %v536_v33  ;;  %v538_v36 = vpop.f32.mrb[5].mxu0  ;;  %1076 = vst.msk [vmem:[%s1995_s3 + $0x7c] sm:$0xf] %vm1044_vm0, %v1269_v32  ;;  %v657_v37 = vadd.f32 %v1705_v12, %v656_v34  ;;  %v658_v38 = vpop.f32.mrb[5].mxu1 }
 0x11e   :  { %v539_v39 = vpop.f32.mrb[6].mxu0  ;;  %v659_v40 = vpop.f32.mrb[6].mxu1 }
 0x11f   :  { %v760_v41 = vmax.f32 %v537_v35, 0.0  ;;  %v540_v42 = vadd.f32 %v1705_v12, %v539_v39  ;;  %v541_v43 = vpop.f32.mrb[7].mxu0  ;;  %v790_v44 = vmax.f32 %v657_v37, 0.0  ;;  %v660_v45 = vadd.f32 %v1705_v12, %v659_v40  ;;  %v661_v46 = vpop.f32.mrb[7].mxu1 }
 0x121   :  { %v1240_v47 = vpack.c.bf16 %v760_v41, %v760_v41  ;;  %v761_v48 = vmax.f32 %v540_v42, 0.0  ;;  %v1270_v49 = vpack.c.bf16 %v790_v44, %v790_v44  ;;  %v791_v50 = vmax.f32 %v660_v45, 0.0 }
 0x123   :  { %1047 = vst.msk [vmem:[%s1995_s3 + $0x8] sm:$0xf] %vm1044_vm0, %v1240_v47  ;;  %v1241_v51 = vpack.c.bf16 %v761_v48, %v761_v48  ;;  %1077 = vst.msk [vmem:[%s1995_s3 + $0x80] sm:$0xf] %vm1044_vm0, %v1270_v49  ;;  %v1271_v52 = vpack.c.bf16 %v791_v50, %v791_v50 }
 0x124   :  { %v544_v53 = vpop.f32.mrb[8].mxu0  ;;  %v664_v54 = vpop.f32.mrb[8].mxu1 }
 0x125   :  { %1048 = vst.msk [vmem:[%s1995_s3 + $0xc] sm:$0xf] %vm1044_vm0, %v1241_v51  ;;  %v545_v55 = vadd.f32 %v1705_v12, %v544_v53  ;;  %v546_v56 = vpop.f32.mrb[9].mxu0  ;;  %1078 = vst.msk [vmem:[%s1995_s3 + $0x84] sm:$0xf] %vm1044_vm0, %v1271_v52  ;;  %v665_v57 = vadd.f32 %v1705_v12, %v664_v54  ;;  %v666_v58 = vpop.f32.mrb[9].mxu1 }
 0x126   :  { %v547_v59 = vpop.f32.mrb[10].mxu0  ;;  %v667_v60 = vpop.f32.mrb[10].mxu1 }
 0x127   :  { %v762_v61 = vmax.f32 %v545_v55, 0.0  ;;  %v548_v62 = vadd.f32 %v1705_v12, %v547_v59  ;;  %v549_v63 = vpop.f32.mrb[11].mxu0  ;;  %v792_v0 = vmax.f32 %v665_v57, 0.0  ;;  %v668_v1 = vadd.f32 %v1705_v12, %v667_v60  ;;  %v669_v2 = vpop.f32.mrb[11].mxu1 }
 0x129   :  { %v1242_v3 = vpack.c.bf16 %v762_v61, %v762_v61  ;;  %v763_v4 = vmax.f32 %v548_v62, 0.0  ;;  %v1272_v5 = vpack.c.bf16 %v792_v0, %v792_v0  ;;  %v793_v6 = vmax.f32 %v668_v1, 0.0 }
 0x12b   :  { %1049 = vst.msk [vmem:[%s1995_s3 + $0x10] sm:$0xf] %vm1044_vm0, %v1242_v3  ;;  %v1243_v7 = vpack.c.bf16 %v763_v4, %v763_v4  ;;  %1079 = vst.msk [vmem:[%s1995_s3 + $0x88] sm:$0xf] %vm1044_vm0, %v1272_v5  ;;  %v1273_v8 = vpack.c.bf16 %v793_v6, %v793_v6 }
 0x12c   :  { %v552_v9 = vpop.f32.mrb[12].mxu0  ;;  %v672_v10 = vpop.f32.mrb[12].mxu1 }
 0x12d   :  { %1050 = vst.msk [vmem:[%s1995_s3 + $0x14] sm:$0xf] %vm1044_vm0, %v1243_v7  ;;  %v553_v11 = vadd.f32 %v1705_v12, %v552_v9  ;;  %v554_v13 = vpop.f32.mrb[13].mxu0  ;;  %1080 = vst.msk [vmem:[%s1995_s3 + $0x8c] sm:$0xf] %vm1044_vm0, %v1273_v8  ;;  %v673_v14 = vadd.f32 %v1705_v12, %v672_v10  ;;  %v674_v15 = vpop.f32.mrb[13].mxu1 }
 0x12e   :  { %v555_v16 = vpop.f32.mrb[14].mxu0  ;;  %v675_v17 = vpop.f32.mrb[14].mxu1 }
 0x12f   :  { %v764_v18 = vmax.f32 %v553_v11, 0.0  ;;  %v556_v19 = vadd.f32 %v1705_v12, %v555_v16  ;;  %v557_v20 = vpop.f32.mrb[15].mxu0  ;;  %v794_v21 = vmax.f32 %v673_v14, 0.0  ;;  %v676_v22 = vadd.f32 %v1705_v12, %v675_v17  ;;  %v677_v23 = vpop.f32.mrb[15].mxu1 }
 0x131   :  { %v1244_v24 = vpack.c.bf16 %v764_v18, %v764_v18  ;;  %v765_v25 = vmax.f32 %v556_v19, 0.0  ;;  %v1274_v26 = vpack.c.bf16 %v794_v21, %v794_v21  ;;  %v795_v27 = vmax.f32 %v676_v22, 0.0 }
 0x133   :  { %1051 = vst.msk [vmem:[%s1995_s3 + $0x18] sm:$0xf] %vm1044_vm0, %v1244_v24  ;;  %v1245_v28 = vpack.c.bf16 %v765_v25, %v765_v25  ;;  %1081 = vst.msk [vmem:[%s1995_s3 + $0x90] sm:$0xf] %vm1044_vm0, %v1274_v26  ;;  %v1275_v29 = vpack.c.bf16 %v795_v27, %v795_v27 }
 0x134   :  { %v560_v30 = vpop.f32.mrb[16].mxu0  ;;  %v680_v31 = vpop.f32.mrb[16].mxu1 }
 0x135   :  { %1052 = vst.msk [vmem:[%s1995_s3 + $0x1c] sm:$0xf] %vm1044_vm0, %v1245_v28  ;;  %v561_v32 = vadd.f32 %v1705_v12, %v560_v30  ;;  %v562_v33 = vpop.f32.mrb[17].mxu0  ;;  %1082 = vst.msk [vmem:[%s1995_s3 + $0x94] sm:$0xf] %vm1044_vm0, %v1275_v29  ;;  %v681_v34 = vadd.f32 %v1705_v12, %v680_v31  ;;  %v682_v35 = vpop.f32.mrb[17].mxu1 }
 0x136   :  { %v563_v36 = vpop.f32.mrb[18].mxu0  ;;  %v683_v37 = vpop.f32.mrb[18].mxu1 }
 0x137   :  { %v766_v38 = vmax.f32 %v561_v32, 0.0  ;;  %v564_v39 = vadd.f32 %v1705_v12, %v563_v36  ;;  %v565_v40 = vpop.f32.mrb[19].mxu0  ;;  %v796_v41 = vmax.f32 %v681_v34, 0.0  ;;  %v684_v42 = vadd.f32 %v1705_v12, %v683_v37  ;;  %v685_v43 = vpop.f32.mrb[19].mxu1 }
 0x139   :  { %v1246_v44 = vpack.c.bf16 %v766_v38, %v766_v38  ;;  %v767_v45 = vmax.f32 %v564_v39, 0.0  ;;  %v1276_v46 = vpack.c.bf16 %v796_v41, %v796_v41  ;;  %v797_v47 = vmax.f32 %v684_v42, 0.0 }
 0x13b   :  { %1053 = vst.msk [vmem:[%s1995_s3 + $0x20] sm:$0xf] %vm1044_vm0, %v1246_v44  ;;  %v1247_v48 = vpack.c.bf16 %v767_v45, %v767_v45  ;;  %1083 = vst.msk [vmem:[%s1995_s3 + $0x98] sm:$0xf] %vm1044_vm0, %v1276_v46  ;;  %v1277_v49 = vpack.c.bf16 %v797_v47, %v797_v47 }
 0x13c   :  { %v568_v50 = vpop.f32.mrb[20].mxu0  ;;  %v688_v51 = vpop.f32.mrb[20].mxu1 }
 0x13d   :  { %1054 = vst.msk [vmem:[%s1995_s3 + $0x24] sm:$0xf] %vm1044_vm0, %v1247_v48  ;;  %v569_v52 = vadd.f32 %v1705_v12, %v568_v50  ;;  %v570_v53 = vpop.f32.mrb[21].mxu0  ;;  %1084 = vst.msk [vmem:[%s1995_s3 + $0x9c] sm:$0xf] %vm1044_vm0, %v1277_v49  ;;  %v689_v54 = vadd.f32 %v1705_v12, %v688_v51  ;;  %v690_v55 = vpop.f32.mrb[21].mxu1 }
 0x13e   :  { %v571_v56 = vpop.f32.mrb[22].mxu0  ;;  %v691_v57 = vpop.f32.mrb[22].mxu1 }
 0x13f   :  { %v768_v58 = vmax.f32 %v569_v52, 0.0  ;;  %v572_v59 = vadd.f32 %v1705_v12, %v571_v56  ;;  %v573_v60 = vpop.f32.mrb[23].mxu0  ;;  %v798_v61 = vmax.f32 %v689_v54, 0.0  ;;  %v692_v62 = vadd.f32 %v1705_v12, %v691_v57  ;;  %v693_v63 = vpop.f32.mrb[23].mxu1 }
 0x141   :  { %v1248_v0 = vpack.c.bf16 %v768_v58, %v768_v58  ;;  %v769_v1 = vmax.f32 %v572_v59, 0.0  ;;  %v1278_v2 = vpack.c.bf16 %v798_v61, %v798_v61  ;;  %v799_v3 = vmax.f32 %v692_v62, 0.0 }
 0x143   :  { %1055 = vst.msk [vmem:[%s1995_s3 + $0x28] sm:$0xf] %vm1044_vm0, %v1248_v0  ;;  %v1249_v4 = vpack.c.bf16 %v769_v1, %v769_v1  ;;  %1085 = vst.msk [vmem:[%s1995_s3 + $0xa0] sm:$0xf] %vm1044_vm0, %v1278_v2  ;;  %v1279_v5 = vpack.c.bf16 %v799_v3, %v799_v3 }
 0x144   :  { %v576_v6 = vpop.f32.mrb[24].mxu0  ;;  %v696_v7 = vpop.f32.mrb[24].mxu1 }
 0x145   :  { %1056 = vst.msk [vmem:[%s1995_s3 + $0x2c] sm:$0xf] %vm1044_vm0, %v1249_v4  ;;  %v577_v8 = vadd.f32 %v1705_v12, %v576_v6  ;;  %v578_v9 = vpop.f32.mrb[25].mxu0  ;;  %1086 = vst.msk [vmem:[%s1995_s3 + $0xa4] sm:$0xf] %vm1044_vm0, %v1279_v5  ;;  %v697_v10 = vadd.f32 %v1705_v12, %v696_v7  ;;  %v698_v11 = vpop.f32.mrb[25].mxu1 }
 0x146   :  { %v579_v13 = vpop.f32.mrb[26].mxu0  ;;  %v699_v14 = vpop.f32.mrb[26].mxu1 }
 0x147   :  { %v770_v15 = vmax.f32 %v577_v8, 0.0  ;;  %v580_v16 = vadd.f32 %v1705_v12, %v579_v13  ;;  %v581_v17 = vpop.f32.mrb[27].mxu0  ;;  %v800_v18 = vmax.f32 %v697_v10, 0.0  ;;  %v700_v19 = vadd.f32 %v1705_v12, %v699_v14  ;;  %v701_v20 = vpop.f32.mrb[27].mxu1 }
 0x149   :  { %v1250_v21 = vpack.c.bf16 %v770_v15, %v770_v15  ;;  %v771_v22 = vmax.f32 %v580_v16, 0.0  ;;  %v1280_v23 = vpack.c.bf16 %v800_v18, %v800_v18  ;;  %v801_v24 = vmax.f32 %v700_v19, 0.0 }
 0x14b   :  { %1057 = vst.msk [vmem:[%s1995_s3 + $0x30] sm:$0xf] %vm1044_vm0, %v1250_v21  ;;  %v1251_v25 = vpack.c.bf16 %v771_v22, %v771_v22  ;;  %1087 = vst.msk [vmem:[%s1995_s3 + $0xa8] sm:$0xf] %vm1044_vm0, %v1280_v23  ;;  %v1281_v26 = vpack.c.bf16 %v801_v24, %v801_v24 }
 0x14c   :  { %v584_v27 = vpop.f32.mrb[28].mxu0  ;;  %v704_v28 = vpop.f32.mrb[28].mxu1 }
 0x14d   :  { %1058 = vst.msk [vmem:[%s1995_s3 + $0x34] sm:$0xf] %vm1044_vm0, %v1251_v25  ;;  %v585_v29 = vadd.f32 %v1705_v12, %v584_v27  ;;  %v586_v30 = vpop.f32.mrb[29].mxu0  ;;  %1088 = vst.msk [vmem:[%s1995_s3 + $0xac] sm:$0xf] %vm1044_vm0, %v1281_v26  ;;  %v705_v31 = vadd.f32 %v1705_v12, %v704_v28  ;;  %v706_v32 = vpop.f32.mrb[29].mxu1 }
 0x14e   :  { %v587_v33 = vpop.f32.mrb[30].mxu0  ;;  %v707_v34 = vpop.f32.mrb[30].mxu1 }
 0x14f   :  { %v772_v35 = vmax.f32 %v585_v29, 0.0  ;;  %v588_v36 = vadd.f32 %v1705_v12, %v587_v33  ;;  %v589_v37 = vpop.f32.mrb[31].mxu0  ;;  %v802_v38 = vmax.f32 %v705_v31, 0.0  ;;  %v708_v39 = vadd.f32 %v1705_v12, %v707_v34  ;;  %v709_v40 = vpop.f32.mrb[31].mxu1 }
 0x151   :  { %v1252_v41 = vpack.c.bf16 %v772_v35, %v772_v35  ;;  %v773_v42 = vmax.f32 %v588_v36, 0.0  ;;  %v1282_v43 = vpack.c.bf16 %v802_v38, %v802_v38  ;;  %v803_v44 = vmax.f32 %v708_v39, 0.0 }
 0x153   :  { %1059 = vst.msk [vmem:[%s1995_s3 + $0x38] sm:$0xf] %vm1044_vm0, %v1252_v41  ;;  %v1253_v45 = vpack.c.bf16 %v773_v42, %v773_v42  ;;  %1089 = vst.msk [vmem:[%s1995_s3 + $0xb0] sm:$0xf] %vm1044_vm0, %v1282_v43  ;;  %v1283_v46 = vpack.c.bf16 %v803_v44, %v803_v44 }
 0x154   :  { %v592_v47 = vpop.f32.mrb[32].mxu0  ;;  %v712_v48 = vpop.f32.mrb[32].mxu1 }
 0x155   :  { %1060 = vst.msk [vmem:[%s1995_s3 + $0x3c] sm:$0xf] %vm1044_vm0, %v1253_v45  ;;  %v593_v49 = vadd.f32 %v1705_v12, %v592_v47  ;;  %v594_v50 = vpop.f32.mrb[33].mxu0  ;;  %1090 = vst.msk [vmem:[%s1995_s3 + $0xb4] sm:$0xf] %vm1044_vm0, %v1283_v46  ;;  %v713_v51 = vadd.f32 %v1705_v12, %v712_v48  ;;  %v714_v52 = vpop.f32.mrb[33].mxu1 }
 0x156   :  { %v595_v53 = vpop.f32.mrb[34].mxu0  ;;  %v715_v54 = vpop.f32.mrb[34].mxu1 }
 0x157   :  { %v774_v55 = vmax.f32 %v593_v49, 0.0  ;;  %v596_v56 = vadd.f32 %v1705_v12, %v595_v53  ;;  %v597_v57 = vpop.f32.mrb[35].mxu0  ;;  %v804_v58 = vmax.f32 %v713_v51, 0.0  ;;  %v716_v59 = vadd.f32 %v1705_v12, %v715_v54  ;;  %v717_v60 = vpop.f32.mrb[35].mxu1 }
 0x159   :  { %v1254_v61 = vpack.c.bf16 %v774_v55, %v774_v55  ;;  %v775_v62 = vmax.f32 %v596_v56, 0.0  ;;  %v1284_v63 = vpack.c.bf16 %v804_v58, %v804_v58  ;;  %v805_v0 = vmax.f32 %v716_v59, 0.0 }
 0x15b   :  { %1061 = vst.msk [vmem:[%s1995_s3 + $0x40] sm:$0xf] %vm1044_vm0, %v1254_v61  ;;  %v1255_v1 = vpack.c.bf16 %v775_v62, %v775_v62  ;;  %1091 = vst.msk [vmem:[%s1995_s3 + $0xb8] sm:$0xf] %vm1044_vm0, %v1284_v63  ;;  %v1285_v2 = vpack.c.bf16 %v805_v0, %v805_v0 }
 0x15c   :  { %v600_v3 = vpop.f32.mrb[36].mxu0  ;;  %v720_v4 = vpop.f32.mrb[36].mxu1 }
 0x15d   :  { %1062 = vst.msk [vmem:[%s1995_s3 + $0x44] sm:$0xf] %vm1044_vm0, %v1255_v1  ;;  %v601_v5 = vadd.f32 %v1705_v12, %v600_v3  ;;  %v602_v6 = vpop.f32.mrb[37].mxu0  ;;  %1092 = vst.msk [vmem:[%s1995_s3 + $0xbc] sm:$0xf] %vm1044_vm0, %v1285_v2  ;;  %v721_v7 = vadd.f32 %v1705_v12, %v720_v4  ;;  %v722_v8 = vpop.f32.mrb[37].mxu1 }
 0x15e   :  { %v603_v9 = vpop.f32.mrb[38].mxu0  ;;  %v723_v10 = vpop.f32.mrb[38].mxu1 }
 0x15f   :  { %v776_v11 = vmax.f32 %v601_v5, 0.0  ;;  %v604_v13 = vadd.f32 %v1705_v12, %v603_v9  ;;  %v605_v14 = vpop.f32.mrb[39].mxu0  ;;  %v806_v15 = vmax.f32 %v721_v7, 0.0  ;;  %v724_v16 = vadd.f32 %v1705_v12, %v723_v10  ;;  %v725_v17 = vpop.f32.mrb[39].mxu1 }
 0x161   :  { %v1256_v18 = vpack.c.bf16 %v776_v11, %v776_v11  ;;  %v777_v19 = vmax.f32 %v604_v13, 0.0  ;;  %v1286_v20 = vpack.c.bf16 %v806_v15, %v806_v15  ;;  %v807_v21 = vmax.f32 %v724_v16, 0.0 }
 0x163   :  { %1063 = vst.msk [vmem:[%s1995_s3 + $0x48] sm:$0xf] %vm1044_vm0, %v1256_v18  ;;  %v1257_v22 = vpack.c.bf16 %v777_v19, %v777_v19  ;;  %1093 = vst.msk [vmem:[%s1995_s3 + $0xc0] sm:$0xf] %vm1044_vm0, %v1286_v20  ;;  %v1287_v23 = vpack.c.bf16 %v807_v21, %v807_v21 }
 0x164   :  { %v608_v24 = vpop.f32.mrb[40].mxu0  ;;  %v728_v25 = vpop.f32.mrb[40].mxu1 }
 0x165   :  { %1064 = vst.msk [vmem:[%s1995_s3 + $0x4c] sm:$0xf] %vm1044_vm0, %v1257_v22  ;;  %v609_v26 = vadd.f32 %v1705_v12, %v608_v24  ;;  %v610_v27 = vpop.f32.mrb[41].mxu0  ;;  %1094 = vst.msk [vmem:[%s1995_s3 + $0xc4] sm:$0xf] %vm1044_vm0, %v1287_v23  ;;  %v729_v28 = vadd.f32 %v1705_v12, %v728_v25  ;;  %v730_v29 = vpop.f32.mrb[41].mxu1 }
 0x166   :  { %v611_v30 = vpop.f32.mrb[42].mxu0  ;;  %v731_v31 = vpop.f32.mrb[42].mxu1 }
 0x167   :  { %v778_v32 = vmax.f32 %v609_v26, 0.0  ;;  %v612_v33 = vadd.f32 %v1705_v12, %v611_v30  ;;  %v613_v34 = vpop.f32.mrb[43].mxu0  ;;  %v808_v35 = vmax.f32 %v729_v28, 0.0  ;;  %v732_v36 = vadd.f32 %v1705_v12, %v731_v31  ;;  %v733_v37 = vpop.f32.mrb[43].mxu1 }
 0x169   :  { %v1258_v38 = vpack.c.bf16 %v778_v32, %v778_v32  ;;  %v779_v39 = vmax.f32 %v612_v33, 0.0  ;;  %v1288_v40 = vpack.c.bf16 %v808_v35, %v808_v35  ;;  %v809_v41 = vmax.f32 %v732_v36, 0.0 }
 0x16b   :  { %1065 = vst.msk [vmem:[%s1995_s3 + $0x50] sm:$0xf] %vm1044_vm0, %v1258_v38  ;;  %v1259_v42 = vpack.c.bf16 %v779_v39, %v779_v39  ;;  %1095 = vst.msk [vmem:[%s1995_s3 + $0xc8] sm:$0xf] %vm1044_vm0, %v1288_v40  ;;  %v1289_v43 = vpack.c.bf16 %v809_v41, %v809_v41 }
 0x16c   :  { %v616_v44 = vpop.f32.mrb[44].mxu0  ;;  %v736_v45 = vpop.f32.mrb[44].mxu1 }
 0x16d   :  { %1066 = vst.msk [vmem:[%s1995_s3 + $0x54] sm:$0xf] %vm1044_vm0, %v1259_v42  ;;  %v617_v46 = vadd.f32 %v1705_v12, %v616_v44  ;;  %v618_v47 = vpop.f32.mrb[45].mxu0  ;;  %1096 = vst.msk [vmem:[%s1995_s3 + $0xcc] sm:$0xf] %vm1044_vm0, %v1289_v43  ;;  %v737_v48 = vadd.f32 %v1705_v12, %v736_v45  ;;  %v738_v49 = vpop.f32.mrb[45].mxu1 }
 0x16e   :  { %v619_v50 = vpop.f32.mrb[46].mxu0  ;;  %v739_v51 = vpop.f32.mrb[46].mxu1 }
 0x16f   :  { %v780_v52 = vmax.f32 %v617_v46, 0.0  ;;  %v620_v53 = vadd.f32 %v1705_v12, %v619_v50  ;;  %v621_v54 = vpop.f32.mrb[47].mxu0  ;;  %v810_v55 = vmax.f32 %v737_v48, 0.0  ;;  %v740_v56 = vadd.f32 %v1705_v12, %v739_v51  ;;  %v741_v57 = vpop.f32.mrb[47].mxu1 }
 0x171   :  { %v1260_v58 = vpack.c.bf16 %v780_v52, %v780_v52  ;;  %v781_v59 = vmax.f32 %v620_v53, 0.0  ;;  %v1290_v60 = vpack.c.bf16 %v810_v55, %v810_v55  ;;  %v811_v61 = vmax.f32 %v740_v56, 0.0 }
 0x173   :  { %1067 = vst.msk [vmem:[%s1995_s3 + $0x58] sm:$0xf] %vm1044_vm0, %v1260_v58  ;;  %v1261_v62 = vpack.c.bf16 %v781_v59, %v781_v59  ;;  %1097 = vst.msk [vmem:[%s1995_s3 + $0xd0] sm:$0xf] %vm1044_vm0, %v1290_v60  ;;  %v1291_v63 = vpack.c.bf16 %v811_v61, %v811_v61 }
 0x174   :  { %v624_v0 = vpop.f32.mrb[48].mxu0  ;;  %v744_v1 = vpop.f32.mrb[48].mxu1 }
 0x175   :  { %1068 = vst.msk [vmem:[%s1995_s3 + $0x5c] sm:$0xf] %vm1044_vm0, %v1261_v62  ;;  %v625_v2 = vadd.f32 %v1705_v12, %v624_v0  ;;  %v626_v3 = vpop.f32.mrb[49].mxu0  ;;  %1098 = vst.msk [vmem:[%s1995_s3 + $0xd4] sm:$0xf] %vm1044_vm0, %v1291_v63  ;;  %v745_v4 = vadd.f32 %v1705_v12, %v744_v1  ;;  %v746_v5 = vpop.f32.mrb[49].mxu1 }
 0x176   :  { %v627_v6 = vpop.f32.mrb[50].mxu0  ;;  %v747_v7 = vpop.f32.mrb[50].mxu1 }
 0x177   :  { %v782_v8 = vmax.f32 %v625_v2, 0.0  ;;  %v628_v9 = vadd.f32 %v1705_v12, %v627_v6  ;;  %v629_v10 = vpop.f32.mrb[51].mxu0  ;;  %v812_v11 = vmax.f32 %v745_v4, 0.0  ;;  %v748_v13 = vadd.f32 %v1705_v12, %v747_v7  ;;  %v749_v14 = vpop.f32.mrb[51].mxu1 }
 0x179   :  { %v1262_v15 = vpack.c.bf16 %v782_v8, %v782_v8  ;;  %v783_v16 = vmax.f32 %v628_v9, 0.0  ;;  %v1292_v17 = vpack.c.bf16 %v812_v11, %v812_v11  ;;  %v813_v18 = vmax.f32 %v748_v13, 0.0 }
 0x17b   :  { %1069 = vst.msk [vmem:[%s1995_s3 + $0x60] sm:$0xf] %vm1044_vm0, %v1262_v15  ;;  %v1263_v19 = vpack.c.bf16 %v783_v16, %v783_v16  ;;  %1099 = vst.msk [vmem:[%s1995_s3 + $0xd8] sm:$0xf] %vm1044_vm0, %v1292_v17  ;;  %v1293_v20 = vpack.c.bf16 %v813_v18, %v813_v18 }
 0x17c   :  { %v632_v21 = vpop.f32.mrb[52].mxu0  ;;  %v752_v22 = vpop.f32.mrb[52].mxu1 }
 0x17d   :  { %1070 = vst.msk [vmem:[%s1995_s3 + $0x64] sm:$0xf] %vm1044_vm0, %v1263_v19  ;;  %v633_v23 = vadd.f32 %v1705_v12, %v632_v21  ;;  %v634_v24 = vpop.f32.mrb[53].mxu0  ;;  %1100 = vst.msk [vmem:[%s1995_s3 + $0xdc] sm:$0xf] %vm1044_vm0, %v1293_v20  ;;  %v753_v25 = vadd.f32 %v1705_v12, %v752_v22  ;;  %v754_v26 = vpop.f32.mrb[53].mxu1 }
 0x17e   :  { %v635_v27 = vpop.f32.mrb[54].mxu0  ;;  %v755_v28 = vpop.f32.mrb[54].mxu1 }
 0x17f   :  { %v784_v29 = vmax.f32 %v633_v23, 0.0  ;;  %v636_v30 = vadd.f32 %v1705_v12, %v635_v27  ;;  %v637_v31 = vpop.f32.mrb[55].mxu0  ;;  %v814_v32 = vmax.f32 %v753_v25, 0.0  ;;  %v756_v33 = vpop.f32.mrb[55].mxu1 }
 0x181   :  { %v1264_v34 = vpack.c.bf16 %v784_v29, %v784_v29  ;;  %v785_v35 = vmax.f32 %v636_v30, 0.0  ;;  %v1294_v36 = vpack.c.bf16 %v814_v32, %v814_v32 }
 0x183   :  { %1071 = vst.msk [vmem:[%s1995_s3 + $0x68] sm:$0xf] %vm1044_vm0, %v1264_v34  ;;  %v1265_v37 = vpack.c.bf16 %v785_v35, %v785_v35  ;;  %1101 = vst.msk [vmem:[%s1995_s3 + $0xe0] sm:$0xf] %vm1044_vm0, %v1294_v36 }
 0x184   :  { %v640_v38 = vpop.f32.mrb[56].mxu0 }
 0x185   :  { %1072 = vst.msk [vmem:[%s1995_s3 + $0x6c] sm:$0xf] %vm1044_vm0, %v1265_v37  ;;  %v641_v39 = vadd.f32 %v1705_v12, %v640_v38  ;;  %v642_v40 = vpop.f32.mrb[57].mxu0 }
 0x186   :  { %v643_v41 = vpop.f32.mrb[58].mxu0 }
 0x187   :  { %v786_v42 = vmax.f32 %v641_v39, 0.0  ;;  %v644_v43 = vadd.f32 %v1705_v12, %v643_v41  ;;  %v645_v44 = vpop.f32.mrb[59].mxu0 }
 0x189   :  { %v1266_v45 = vpack.c.bf16 %v786_v42, %v786_v42  ;;  %v787_v46 = vmax.f32 %v644_v43, 0.0 }
 0x18b   :  { %1073 = vst.msk [vmem:[%s1995_s3 + $0x70] sm:$0xf] %vm1044_vm0, %v1266_v45  ;;  %v1267_v47 = vpack.c.bf16 %v787_v46, %v787_v46 }
 0x18d   :  { %1074 = vst.msk [vmem:[%s1995_s3 + $0x74] sm:$0xf] %vm1044_vm0, %v1267_v47 }

// kernel: policy_forward.5
= control target key start
LH: loop header
LB: loop body
LE: loop exit
PB: predicated region body
PF: predicated region fallthrough
CT: control target
= control target key end

     0   :  { %vm580_vm0 = vcmask 519168   ;;  %s1037_s1 = inlined_call_operand.vmem [shape: bf16[512,64], index: 1, kind: input, shape index: {}]   ;;  %s1038_s0 = inlined_call_operand.vmem [shape: bf16[72,512], index: 0, kind: input, shape index: {}]   ;;  %s1039_s2 = inlined_call_operand.vmem [shape: f32[1,64], index: 2, kind: input, shape index: {}]   ;;  %s1040_s3 = inlined_call_operand.vmem [shape: bf16[72,64], index: 3, kind: output, shape index: {}]  }
   0x1   :  { %v757_v0 = vld [vmem:[%s1037_s1 + $0x40] sm:$0xff]   ;;  %v761_v4 = vld [vmem:[%s1037_s1 + $0x48] sm:$0xff]   ;;  %v765_v8 = vld [vmem:[%s1037_s1 + $0x50] sm:$0xff]  }
   0x2   :  { %v758_v1 = vld [vmem:[%s1037_s1 + $0xc0] sm:$0xff]   ;;  %665 = vmatprep.subr.bf16.mxu0 %v757_v0  ;;  %v762_v5 = vld [vmem:[%s1037_s1 + $0xc8] sm:$0xff]   ;;  %v766_v9 = vld [vmem:[%s1037_s1 + $0xd0] sm:$0xff]  }
   0x3   :  { %v759_v2 = vld [vmem:[%s1037_s1] sm:$0xff]   ;;  %711 = vmatprep.subr.bf16.mxu1 %v758_v1  ;;  %v763_v6 = vld [vmem:[%s1037_s1 + $0x8] sm:$0xff]   ;;  %v767_v10 = vld [vmem:[%s1037_s1 + $0x10] sm:$0xff]  }
   0x4   :  { %v760_v3 = vld [vmem:[%s1037_s1 + $0x80] sm:$0xff]   ;;  %666 = vmatpush3.bf16.msra.mxu0 %v759_v2  ;;  %v764_v7 = vld [vmem:[%s1037_s1 + $0x88] sm:$0xff]   ;;  %v768_v11 = vld [vmem:[%s1037_s1 + $0x90] sm:$0xff]  }
   0x5   :  { %712 = vmatpush3.bf16.msra.mxu1 %v760_v3  ;;  %667 = vmatprep.subr.bf16.mxu0 %v761_v4  ;;  %v769_v12 = vld [vmem:[%s1037_s1 + $0x58] sm:$0xff]   ;;  %v773_v16 = vld [vmem:[%s1037_s1 + $0x60] sm:$0xff]   ;;  %v777_v20 = vld [vmem:[%s1037_s1 + $0x68] sm:$0xff]  }
   0x6   :  { %713 = vmatprep.subr.bf16.mxu1 %v762_v5  ;;  %v770_v13 = vld [vmem:[%s1037_s1 + $0xd8] sm:$0xff]   ;;  %v774_v17 = vld [vmem:[%s1037_s1 + $0xe0] sm:$0xff]   ;;  %v778_v21 = vld [vmem:[%s1037_s1 + $0xe8] sm:$0xff]  }
   0x7   :  { %v771_v14 = vld [vmem:[%s1037_s1 + $0x18] sm:$0xff]   ;;  %v775_v18 = vld [vmem:[%s1037_s1 + $0x20] sm:$0xff]   ;;  %v779_v22 = vld [vmem:[%s1037_s1 + $0x28] sm:$0xff]  }
   0x8   :  { %668 = vmatpush3.bf16.msra.mxu0 %v763_v6  ;;  %v772_v15 = vld [vmem:[%s1037_s1 + $0x98] sm:$0xff]   ;;  %v776_v19 = vld [vmem:[%s1037_s1 + $0xa0] sm:$0xff]   ;;  %v780_v23 = vld [vmem:[%s1037_s1 + $0xa8] sm:$0xff]  }
   0x9   :  { %714 = vmatpush3.bf16.msra.mxu1 %v764_v7  ;;  %669 = vmatprep.subr.bf16.mxu0 %v765_v8  ;;  %v781_v24 = vld [vmem:[%s1037_s1 + $0x70] sm:$0xff]   ;;  %v785_v28 = vld [vmem:[%s1037_s1 + $0x78] sm:$0xff]   ;;  %v31_v46 = vld [vmem:[%s1038_s0 + $0x80] sm:$0xff] }
   0xa   :  { %715 = vmatprep.subr.bf16.mxu1 %v766_v9  ;;  %v782_v25 = vld [vmem:[%s1037_s1 + $0xf0] sm:$0xff]   ;;  %v786_v29 = vld [vmem:[%s1037_s1 + $0xf8] sm:$0xff]   ;;  %v32_v47 = vld [vmem:[%s1038_s0 + $0x88] sm:$0xff]  ;;  %v612_v50 = vcombine.high %v31_v46, %v31_v46  ;;  %v611_v52 = vcombine.low %v31_v46, %v31_v46 }
   0xb   :  { %v783_v26 = vld [vmem:[%s1037_s1 + $0x30] sm:$0xff]   ;;  %v787_v30 = vld [vmem:[%s1037_s1 + $0x38] sm:$0xff]   ;;  %v614_v51 = vcombine.high %v32_v47, %v32_v47  ;;  %v613_v53 = vcombine.low %v32_v47, %v32_v47  ;;  %v990_v56 = vld [vmem:[%s1039_s2] ss:$0 sm:$0xff] }
   0xc   :  { %670 = vmatpush3.bf16.msra.mxu0 %v767_v10  ;;  %v784_v27 = vld [vmem:[%s1037_s1 + $0xb0] sm:$0xff]   ;;  %v788_v31 = vld [vmem:[%s1037_s1 + $0xb8] sm:$0xff]  }
   0xd   :  { %716 = vmatpush3.bf16.msra.mxu1 %v768_v11  ;;  %671 = vmatprep.subr.bf16.mxu0 %v769_v12  ;;  %v789_v32 = vld [vmem:[%s1038_s0] ss:$16 sps:$4 sm:$0xff]   ;;  %v791_v33 = vld [vmem:[%s1038_s0 + $0x4] ss:$16 sps:$4 sm:$0xff]   ;;  %v792_v34 = vld [vmem:[%s1038_s0 + $0x8] ss:$16 sps:$4 sm:$0xff]  }
   0xe   :  { %717 = vmatprep.subr.bf16.mxu1 %v770_v13  ;;  %v794_v35 = vld [vmem:[%s1038_s0 + $0xc] ss:$16 sps:$4 sm:$0xff]   ;;  %422 = vmatprep.mubr.bf16.mxu0 %v791_v33  ;;  %v795_v36 = vld [vmem:[%s1038_s0 + $0x24] ss:$16 sps:$4 sm:$0xff]   ;;  %v799_v38 = vld [vmem:[%s1038_s0 + $0x20] ss:$16 sps:$4 sm:$0xff]  }
   0xf   :  { %494 = vmatprep.mubr.bf16.mxu1 %v794_v35  ;;  %v797_v37 = vld [vmem:[%s1038_s0 + $0x2c] ss:$16 sps:$4 sm:$0xff]   ;;  %v800_v39 = vld [vmem:[%s1038_s0 + $0x28] ss:$16 sps:$4 sm:$0xff]   ;;  %v801_v40 = vld [vmem:[%s1038_s0 + $0x44] ss:$16 sps:$4 sm:$0xff]  }
  0x10   :  { %672 = vmatpush3.bf16.msra.mxu0 %v771_v14  ;;  %v803_v41 = vld [vmem:[%s1038_s0 + $0x4c] ss:$16 sps:$4 sm:$0xff]   ;;  %v805_v42 = vld [vmem:[%s1038_s0 + $0x40] ss:$16 sps:$4 sm:$0xff]   ;;  %v806_v43 = vld [vmem:[%s1038_s0 + $0x48] ss:$16 sps:$4 sm:$0xff]  }
  0x11   :  { %718 = vmatpush3.bf16.msra.mxu1 %v772_v15  ;;  %673 = vmatprep.subr.bf16.mxu0 %v773_v16  ;;  %v807_v44 = vld [vmem:[%s1038_s0 + $0x64] ss:$16 sps:$4 sm:$0xff]   ;;  %v809_v45 = vld [vmem:[%s1038_s0 + $0x6c] ss:$16 sps:$4 sm:$0xff]   ;;  %v811_v48 = vld [vmem:[%s1038_s0 + $0x60] ss:$16 sps:$4 sm:$0xff]  }
  0x12   :  { %719 = vmatprep.subr.bf16.mxu1 %v774_v17  ;;  %v812_v49 = vld [vmem:[%s1038_s0 + $0x68] ss:$16 sps:$4 sm:$0xff]  }
  0x14   :  { %674 = vmatpush3.bf16.msra.mxu0 %v775_v18 }
  0x15   :  { %720 = vmatpush3.bf16.msra.mxu1 %v776_v19  ;;  %675 = vmatprep.subr.bf16.mxu0 %v777_v20 }
  0x16   :  { %721 = vmatprep.subr.bf16.mxu1 %v778_v21 }
  0x18   :  { %676 = vmatpush3.bf16.msra.mxu0 %v779_v22 }
  0x19   :  { %722 = vmatpush3.bf16.msra.mxu1 %v780_v23  ;;  %677 = vmatprep.subr.bf16.mxu0 %v781_v24 }
  0x1a   :  { %723 = vmatprep.subr.bf16.mxu1 %v782_v25 }
  0x1c   :  { %678 = vmatpush3.bf16.msra.mxu0 %v783_v26 }
  0x1d   :  { %724 = vmatpush3.bf16.msra.mxu1 %v784_v27  ;;  %679 = vmatprep.subr.bf16.mxu0 %v785_v28 }
  0x1e   :  { %725 = vmatprep.subr.bf16.mxu1 %v786_v29 }
  0x20   :  { %680 = vmatpush3.bf16.msra.mxu0 %v787_v30 }
  0x21   :  { %726 = vmatpush3.bf16.msra.mxu1 %v788_v31 }
  0x23   :  { %423 = vmatmul.mubr.bf16.vlgmr.msra.gmra.mrb[0].mxu0 %v789_v32 }
  0x24   :  { %495 = vmatmul.mubr.bf16.vlgmr.msra.gmra.mrb[0].mxu1 %v792_v34  ;;  %430 = vmatprep.mubr.bf16.mxu0 %v795_v36 }
  0x25   :  { %502 = vmatprep.mubr.bf16.mxu1 %v797_v37 }
  0x2b   :  { %431 = vmatmul.mubr.bf16.gmra.mrb[4].mxu0 %v799_v38 }
  0x2c   :  { %503 = vmatmul.mubr.bf16.gmra.mrb[4].mxu1 %v800_v39  ;;  %438 = vmatprep.mubr.bf16.mxu0 %v801_v40 }
  0x2d   :  { %510 = vmatprep.mubr.bf16.mxu1 %v803_v41 }
  0x33   :  { %439 = vmatmul.mubr.bf16.gmra.mrb[8].mxu0 %v805_v42 }
  0x34   :  { %511 = vmatmul.mubr.bf16.gmra.mrb[8].mxu1 %v806_v43  ;;  %446 = vmatprep.mubr.bf16.mxu0 %v807_v44 }
  0x35   :  { %518 = vmatprep.mubr.bf16.mxu1 %v809_v45 }
  0x3b   :  { %447 = vmatmul.mubr.bf16.gmra.mrb[12].mxu0 %v811_v48 }
  0x3c   :  { %519 = vmatmul.mubr.bf16.gmra.mrb[12].mxu1 %v812_v49  ;;  %454 = vmatprep.mubr.bf16.mxu0 %v612_v50 }
  0x3d   :  { %526 = vmatprep.mubr.bf16.mxu1 %v614_v51 }
  0x43   :  { %455 = vmatmul.mubr.bf16.gmra.mrb[16].mxu0 %v611_v52 }
  0x44   :  { %527 = vmatmul.mubr.bf16.gmra.mrb[16].mxu1 %v613_v53 }
  0xf6   :  { %v681_v54 = vpop.f32.mrb[0].mxu0 }
  0xf7   :  { %v727_v55 = vpop.f32.mrb[0].mxu1  ;;  %v682_v57 = vpop.f32.mrb[1].mxu0 }
  0xf8   :  { %v683_v58 = vadd.f32 %v682_v57, %v681_v54  ;;  %v728_v59 = vpop.f32.mrb[1].mxu1  ;;  %v684_v60 = vpop.f32.mrb[2].mxu0 }
  0xf9   :  { %v729_v61 = vadd.f32 %v728_v59, %v727_v55  ;;  %v730_v62 = vpop.f32.mrb[2].mxu1  ;;  %v685_v63 = vpop.f32.mrb[3].mxu0 }
  0xfa   :  { %v425_v0 = vadd.f32 %v683_v58, %v990_v56  ;;  %v686_v1 = vadd.f32 %v685_v63, %v684_v60  ;;  %v731_v2 = vpop.f32.mrb[3].mxu1 }
  0xfb   :  { %v732_v3 = vadd.f32 %v731_v2, %v730_v62 }
  0xfc   :  { %v497_v4 = vadd.f32 %v729_v61, %v425_v0  ;;  %v428_v5 = vadd.f32 %v686_v1, %v990_v56 }
  0xfe   :  { %v534_v6 = vmax.f32 %v497_v4, 0.0  ;;  %v500_v7 = vadd.f32 %v732_v3, %v428_v5  ;;  %v687_v8 = vpop.f32.mrb[4].mxu0 }
  0xff   :  { %v733_v9 = vpop.f32.mrb[4].mxu1  ;;  %v688_v10 = vpop.f32.mrb[5].mxu0 }
 0x100   :  { %v656_v11 = vpack.c.bf16 %v534_v6, %v534_v6  ;;  %v535_v12 = vmax.f32 %v500_v7, 0.0  ;;  %v689_v13 = vadd.f32 %v688_v10, %v687_v8  ;;  %v734_v14 = vpop.f32.mrb[5].mxu1  ;;  %v690_v15 = vpop.f32.mrb[6].mxu0 }
 0x101   :  { %v735_v16 = vadd.f32 %v734_v14, %v733_v9  ;;  %v736_v17 = vpop.f32.mrb[6].mxu1  ;;  %v691_v18 = vpop.f32.mrb[7].mxu0 }
 0x102   :  { %581 = vst.msk [vmem:[%s1040_s3] sm:$0xf] %vm580_vm0, %v656_v11  ;;  %v657_v19 = vpack.c.bf16 %v535_v12, %v535_v12  ;;  %v433_v20 = vadd.f32 %v689_v13, %v990_v56  ;;  %v692_v21 = vadd.f32 %v691_v18, %v690_v15  ;;  %v737_v22 = vpop.f32.mrb[7].mxu1 }
 0x103   :  { %v738_v23 = vadd.f32 %v737_v22, %v736_v17 }
 0x104   :  { %582 = vst.msk [vmem:[%s1040_s3 + $0x4] sm:$0xf] %vm580_vm0, %v657_v19  ;;  %v505_v24 = vadd.f32 %v735_v16, %v433_v20  ;;  %v436_v25 = vadd.f32 %v692_v21, %v990_v56 }
 0x106   :  { %v536_v26 = vmax.f32 %v505_v24, 0.0  ;;  %v508_v27 = vadd.f32 %v738_v23, %v436_v25  ;;  %v693_v28 = vpop.f32.mrb[8].mxu0 }
 0x107   :  { %v739_v29 = vpop.f32.mrb[8].mxu1  ;;  %v694_v30 = vpop.f32.mrb[9].mxu0 }
 0x108   :  { %v658_v31 = vpack.c.bf16 %v536_v26, %v536_v26  ;;  %v537_v32 = vmax.f32 %v508_v27, 0.0  ;;  %v695_v33 = vadd.f32 %v694_v30, %v693_v28  ;;  %v740_v34 = vpop.f32.mrb[9].mxu1  ;;  %v696_v35 = vpop.f32.mrb[10].mxu0 }
 0x109   :  { %v741_v36 = vadd.f32 %v740_v34, %v739_v29  ;;  %v742_v37 = vpop.f32.mrb[10].mxu1  ;;  %v697_v38 = vpop.f32.mrb[11].mxu0 }
 0x10a   :  { %583 = vst.msk [vmem:[%s1040_s3 + $0x8] sm:$0xf] %vm580_vm0, %v658_v31  ;;  %v659_v39 = vpack.c.bf16 %v537_v32, %v537_v32  ;;  %v441_v40 = vadd.f32 %v695_v33, %v990_v56  ;;  %v698_v41 = vadd.f32 %v697_v38, %v696_v35  ;;  %v743_v42 = vpop.f32.mrb[11].mxu1 }
 0x10b   :  { %v744_v43 = vadd.f32 %v743_v42, %v742_v37 }
 0x10c   :  { %584 = vst.msk [vmem:[%s1040_s3 + $0xc] sm:$0xf] %vm580_vm0, %v659_v39  ;;  %v513_v44 = vadd.f32 %v741_v36, %v441_v40  ;;  %v444_v45 = vadd.f32 %v698_v41, %v990_v56 }
 0x10e   :  { %v538_v46 = vmax.f32 %v513_v44, 0.0  ;;  %v516_v47 = vadd.f32 %v744_v43, %v444_v45  ;;  %v699_v48 = vpop.f32.mrb[12].mxu0 }
 0x10f   :  { %v745_v49 = vpop.f32.mrb[12].mxu1  ;;  %v700_v50 = vpop.f32.mrb[13].mxu0 }
 0x110   :  { %v660_v51 = vpack.c.bf16 %v538_v46, %v538_v46  ;;  %v539_v52 = vmax.f32 %v516_v47, 0.0  ;;  %v701_v53 = vadd.f32 %v700_v50, %v699_v48  ;;  %v746_v54 = vpop.f32.mrb[13].mxu1  ;;  %v702_v55 = vpop.f32.mrb[14].mxu0 }
 0x111   :  { %v747_v57 = vadd.f32 %v746_v54, %v745_v49  ;;  %v748_v58 = vpop.f32.mrb[14].mxu1  ;;  %v703_v59 = vpop.f32.mrb[15].mxu0 }
 0x112   :  { %585 = vst.msk [vmem:[%s1040_s3 + $0x10] sm:$0xf] %vm580_vm0, %v660_v51  ;;  %v661_v60 = vpack.c.bf16 %v539_v52, %v539_v52  ;;  %v449_v61 = vadd.f32 %v701_v53, %v990_v56  ;;  %v704_v62 = vadd.f32 %v703_v59, %v702_v55  ;;  %v749_v63 = vpop.f32.mrb[15].mxu1 }
 0x113   :  { %v750_v0 = vadd.f32 %v749_v63, %v748_v58 }
 0x114   :  { %586 = vst.msk [vmem:[%s1040_s3 + $0x14] sm:$0xf] %vm580_vm0, %v661_v60  ;;  %v521_v1 = vadd.f32 %v747_v57, %v449_v61  ;;  %v452_v2 = vadd.f32 %v704_v62, %v990_v56 }
 0x116   :  { %v540_v3 = vmax.f32 %v521_v1, 0.0  ;;  %v524_v4 = vadd.f32 %v750_v0, %v452_v2  ;;  %v705_v5 = vpop.f32.mrb[16].mxu0 }
 0x117   :  { %v751_v6 = vpop.f32.mrb[16].mxu1  ;;  %v706_v7 = vpop.f32.mrb[17].mxu0 }
 0x118   :  { %v662_v8 = vpack.c.bf16 %v540_v3, %v540_v3  ;;  %v541_v9 = vmax.f32 %v524_v4, 0.0  ;;  %v707_v10 = vadd.f32 %v706_v7, %v705_v5  ;;  %v752_v11 = vpop.f32.mrb[17].mxu1  ;;  %v708_v12 = vpop.f32.mrb[18].mxu0 }
 0x119   :  { %v753_v13 = vadd.f32 %v752_v11, %v751_v6  ;;  %v754_v14 = vpop.f32.mrb[18].mxu1  ;;  %v709_v15 = vpop.f32.mrb[19].mxu0 }
 0x11a   :  { %587 = vst.msk [vmem:[%s1040_s3 + $0x18] sm:$0xf] %vm580_vm0, %v662_v8  ;;  %v663_v16 = vpack.c.bf16 %v541_v9, %v541_v9  ;;  %v457_v17 = vadd.f32 %v707_v10, %v990_v56  ;;  %v755_v18 = vpop.f32.mrb[19].mxu1 }
 0x11c   :  { %588 = vst.msk [vmem:[%s1040_s3 + $0x1c] sm:$0xf] %vm580_vm0, %v663_v16  ;;  %v529_v19 = vadd.f32 %v753_v13, %v457_v17 }
 0x11e   :  { %v542_v20 = vmax.f32 %v529_v19, 0.0 }
 0x120   :  { %v664_v21 = vpack.c.bf16 %v542_v20, %v542_v20 }
 0x122   :  { %589 = vst.msk [vmem:[%s1040_s3 + $0x20] sm:$0xf] %vm580_vm0, %v664_v21 }

// kernel: policy_forward.6
= control target key start
LH: loop header
LB: loop body
LE: loop exit
PB: predicated region body
PF: predicated region fallthrough
CT: control target
= control target key end

     0   :  { %vm372_vm0 = vcmask 523264   ;;  %vm546_vm1 = vcmask 257024   ;;  %s909_s1 = inlined_call_operand.vmem [shape: bf16[576,32], index: 1, kind: input, shape index: {}]   ;;  %s910_s0 = inlined_call_operand.vmem [shape: bf16[32,576], index: 0, kind: input, shape index: {}]   ;;  %s911_s2 = inlined_call_operand.vmem [shape: f32[1,32], index: 2, kind: input, shape index: {}]   ;;  %s912_s3 = inlined_call_operand.vmem [shape: bf16[32,32], index: 3, kind: output, shape index: {}]  }
   0x1   :  { %v686_v0 = vld [vmem:[%s909_s1 + $0x40] sm:$0xff]   ;;  %v690_v4 = vld [vmem:[%s909_s1 + $0x48] sm:$0xff]   ;;  %v694_v8 = vld [vmem:[%s909_s1 + $0x50] sm:$0xff]  }
   0x2   :  { %v687_v1 = vld [vmem:[%s909_s1] sm:$0xff]   ;;  %612 = vmatprep.subr.bf16.mxu0 %v686_v0  ;;  %v691_v5 = vld [vmem:[%s909_s1 + $0x8] sm:$0xff]   ;;  %v695_v9 = vld [vmem:[%s909_s1 + $0x10] sm:$0xff]  }
   0x3   :  { %v688_v2 = vld [vmem:[%s909_s1 + $0xc0] sm:$0xff]   ;;  %613 = vmatpush3.bf16.msra.mxu0 %v687_v1  ;;  %v692_v6 = vld [vmem:[%s909_s1 + $0xc8] sm:$0xff]   ;;  %v696_v10 = vld [vmem:[%s909_s1 + $0xd0] sm:$0xff]  }
   0x4   :  { %v689_v3 = vld [vmem:[%s909_s1 + $0x80] sm:$0xff]   ;;  %640 = vmatprep.subr.bf16.mxu1 %v688_v2  ;;  %614 = vmatprep.subr.bf16.mxu0 %v690_v4  ;;  %v693_v7 = vld [vmem:[%s909_s1 + $0x88] sm:$0xff]   ;;  %v697_v11 = vld [vmem:[%s909_s1 + $0x90] sm:$0xff]  }
   0x5   :  { %641 = vmatpush3.bf16.msra.mxu1 %v689_v3  ;;  %v698_v12 = vld [vmem:[%s909_s1 + $0x58] sm:$0xff]   ;;  %v702_v16 = vld [vmem:[%s909_s1 + $0x60] sm:$0xff]   ;;  %v706_v20 = vld [vmem:[%s909_s1 + $0x68] sm:$0xff]  }
   0x6   :  { %642 = vmatprep.subr.bf16.mxu1 %v692_v6  ;;  %v699_v13 = vld [vmem:[%s909_s1 + $0x18] sm:$0xff]   ;;  %v703_v17 = vld [vmem:[%s909_s1 + $0x20] sm:$0xff]   ;;  %v707_v21 = vld [vmem:[%s909_s1 + $0x28] sm:$0xff]  }
   0x7   :  { %615 = vmatpush3.bf16.msra.mxu0 %v691_v5  ;;  %v700_v14 = vld [vmem:[%s909_s1 + $0xd8] sm:$0xff]   ;;  %v704_v18 = vld [vmem:[%s909_s1 + $0xe0] sm:$0xff]   ;;  %v708_v22 = vld [vmem:[%s909_s1 + $0xe8] sm:$0xff]  }
   0x8   :  { %616 = vmatprep.subr.bf16.mxu0 %v694_v8  ;;  %v701_v15 = vld [vmem:[%s909_s1 + $0x98] sm:$0xff]   ;;  %v705_v19 = vld [vmem:[%s909_s1 + $0xa0] sm:$0xff]   ;;  %v709_v23 = vld [vmem:[%s909_s1 + $0xa8] sm:$0xff]  }
   0x9   :  { %643 = vmatpush3.bf16.msra.mxu1 %v693_v7  ;;  %v710_v24 = vld [vmem:[%s909_s1 + $0x70] sm:$0xff]   ;;  %v714_v28 = vld [vmem:[%s909_s1 + $0x78] sm:$0xff]   ;;  %v721_v34 = vld [vmem:[%s909_s1 + $0x100] sm:$0xff]  }
   0xa   :  { %644 = vmatprep.subr.bf16.mxu1 %v696_v10  ;;  %v711_v25 = vld [vmem:[%s909_s1 + $0x30] sm:$0xff]   ;;  %v715_v29 = vld [vmem:[%s909_s1 + $0x38] sm:$0xff]   ;;  %v724_v36 = vld [vmem:[%s910_s0 + $0xc] ss:$20 sps:$4 sm:$0xff]  }
   0xb   :  { %617 = vmatpush3.bf16.msra.mxu0 %v695_v9  ;;  %v712_v26 = vld [vmem:[%s909_s1 + $0xf0] sm:$0xff]   ;;  %v716_v30 = vld [vmem:[%s909_s1 + $0xf8] sm:$0xff]   ;;  %v725_v37 = vld [vmem:[%s909_s1 + $0x108] sm:$0xff]   ;;  %460 = vmatprep.mubr.bf16.mxu1 %v724_v36 }
   0xc   :  { %618 = vmatprep.subr.bf16.mxu0 %v698_v12  ;;  %v713_v27 = vld [vmem:[%s909_s1 + $0xb0] sm:$0xff]   ;;  %v719_v32 = vld [vmem:[%s910_s0 + $0x4] ss:$20 sps:$4 sm:$0xff]   ;;  %v722_v35 = vld [vmem:[%s910_s0 + $0x8] ss:$20 sps:$4 sm:$0xff]  }
   0xd   :  { %645 = vmatpush3.bf16.msra.mxu1 %v697_v11  ;;  %v717_v31 = vld [vmem:[%s910_s0] ss:$20 sps:$4 sm:$0xff]   ;;  %v720_v33 = vld [vmem:[%s909_s1 + $0xb8] sm:$0xff]   ;;  %411 = vmatprep.mubr.bf16.mxu0 %v719_v32  ;;  %v732_v42 = vld [vmem:[%s910_s0 + $0x30] ss:$20 sps:$4 sm:$0xff]  }
   0xe   :  { %646 = vmatprep.subr.bf16.mxu1 %v700_v14  ;;  %v726_v38 = vld [vmem:[%s910_s0 + $0x2c] ss:$20 sps:$4 sm:$0xff]   ;;  %v728_v39 = vld [vmem:[%s910_s0 + $0x28] ss:$20 sps:$4 sm:$0xff]   ;;  %v729_v40 = vld [vmem:[%s909_s1 + $0x110] sm:$0xff]  }
   0xf   :  { %619 = vmatpush3.bf16.msra.mxu0 %v699_v13  ;;  %v730_v41 = vld [vmem:[%s910_s0 + $0x34] ss:$20 sps:$4 sm:$0xff]   ;;  %v733_v43 = vld [vmem:[%s909_s1 + $0x118] sm:$0xff]   ;;  %v734_v44 = vld [vmem:[%s910_s0 + $0x10] ss:$20 sps:$4 sm:$0xff]  }
  0x10   :  { %620 = vmatprep.subr.bf16.mxu0 %v702_v16  ;;  %v735_v45 = vld [vmem:[%s910_s0 + $0x38] ss:$20 sps:$4 sm:$0xff]   ;;  %v555_v47 = vld [vmem:[%s911_s2] ss:$0 sm:$0xff] }
  0x11   :  { %647 = vmatpush3.bf16.msra.mxu1 %v701_v15 }
  0x12   :  { %648 = vmatprep.subr.bf16.mxu1 %v704_v18 }
  0x13   :  { %621 = vmatpush3.bf16.msra.mxu0 %v703_v17 }
  0x14   :  { %622 = vmatprep.subr.bf16.mxu0 %v706_v20 }
  0x15   :  { %649 = vmatpush3.bf16.msra.mxu1 %v705_v19 }
  0x16   :  { %650 = vmatprep.subr.bf16.mxu1 %v708_v22 }
  0x17   :  { %623 = vmatpush3.bf16.msra.mxu0 %v707_v21 }
  0x18   :  { %624 = vmatprep.subr.bf16.mxu0 %v710_v24 }
  0x19   :  { %651 = vmatpush3.bf16.msra.mxu1 %v709_v23 }
  0x1a   :  { %652 = vmatprep.subr.bf16.mxu1 %v712_v26 }
  0x1b   :  { %625 = vmatpush3.bf16.msra.mxu0 %v711_v25 }
  0x1c   :  { %626 = vmatprep.subr.bf16.mxu0 %v714_v28 }
  0x1d   :  { %653 = vmatpush3.bf16.msra.mxu1 %v713_v27 }
  0x1e   :  { %654 = vmatprep.subr.bf16.mxu1 %v716_v30 }
  0x1f   :  { %627 = vmatpush3.bf16.msra.mxu0 %v715_v29 }
  0x20   :  { %674 = vmatprep.subr.bf16.mxu0 %v721_v34 }
  0x21   :  { %655 = vmatpush3.bf16.msra.mxu1 %v720_v33 }
  0x22   :  { %412 = vmatmul.mubr.bf16.vlgmr.msra.gmra.mrb[0].mxu0 %v717_v31 }
  0x23   :  { %675 = vmatpush3.bf16.msra.mxu0 %v721_v34  ;;  %419 = vmatprep.mubr.bf16.mxu0 %v726_v38 }
  0x24   :  { %461 = vmatmul.mubr.bf16.vlgmr.msra.gmra.mrb[0].mxu1 %v722_v35  ;;  %676 = vmatprep.subr.bf16.mxu0 %v725_v37 }
  0x25   :  { %468 = vmatprep.mubr.bf16.mxu1 %v730_v41 }
  0x27   :  { %677 = vmatpush3.bf16.msra.mxu0 %v725_v37 }
  0x28   :  { %678 = vmatprep.subr.bf16.mxu0 %v729_v40 }
  0x2a   :  { %420 = vmatmul.mubr.bf16.gmra.mrb[4].mxu0 %v728_v39 }
  0x2b   :  { %682 = vmatprep.mubr.msk.bf16.mxu0 %vm372_vm0, %v734_v44  ;;  %679 = vmatpush3.bf16.msra.mxu0 %v729_v40 }
  0x2c   :  { %469 = vmatmul.mubr.bf16.gmra.mrb[4].mxu1 %v732_v42  ;;  %680 = vmatprep.subr.bf16.mxu0 %v733_v43 }
  0x2f   :  { %681 = vmatpush3.bf16.msra.mxu0 %v733_v43 }
  0x32   :  { %683 = vmatmul.mubr.msk.bf16.vlgmr.msra.gmra.mrb[8].mxu0 %vm372_vm0, %v735_v45 }
  0xf5   :  { %v628_v46 = vpop.f32.mrb[0].mxu0 }
  0xf6   :  { %v629_v48 = vpop.f32.mrb[1].mxu0 }
  0xf7   :  { %v630_v49 = vadd.f32 %v629_v48, %v628_v46  ;;  %v631_v50 = vpop.f32.mrb[2].mxu0  ;;  %v656_v51 = vpop.f32.mrb[0].mxu1 }
  0xf8   :  { %v632_v52 = vpop.f32.mrb[3].mxu0  ;;  %v657_v55 = vpop.f32.mrb[1].mxu1 }
  0xf9   :  { %v414_v53 = vadd.f32 %v630_v49, %v555_v47  ;;  %v633_v54 = vadd.f32 %v632_v52, %v631_v50  ;;  %v658_v56 = vadd.f32 %v657_v55, %v656_v51  ;;  %v659_v57 = vpop.f32.mrb[2].mxu1 }
  0xfa   :  { %v660_v59 = vpop.f32.mrb[3].mxu1 }
  0xfb   :  { %v417_v58 = vadd.f32 %v633_v54, %v555_v47  ;;  %v661_v60 = vadd.f32 %v660_v59, %v659_v57  ;;  %v463_v61 = vadd.f32 %v658_v56, %v414_v53 }
  0xfd   :  { %v634_v62 = vpop.f32.mrb[4].mxu0  ;;  %v466_v0 = vadd.f32 %v661_v60, %v417_v58 }
  0xfe   :  { %v635_v63 = vpop.f32.mrb[5].mxu0 }
  0xff   :  { %v636_v1 = vadd.f32 %v635_v63, %v634_v62  ;;  %v637_v2 = vpop.f32.mrb[6].mxu0  ;;  %v662_v3 = vpop.f32.mrb[4].mxu1 }
 0x100   :  { %v638_v4 = vpop.f32.mrb[7].mxu0  ;;  %v663_v7 = vpop.f32.mrb[5].mxu1 }
 0x101   :  { %v422_v5 = vadd.f32 %v636_v1, %v555_v47  ;;  %v639_v6 = vadd.f32 %v638_v4, %v637_v2  ;;  %v664_v8 = vadd.f32 %v663_v7, %v662_v3  ;;  %v665_v9 = vpop.f32.mrb[6].mxu1 }
 0x102   :  { %v666_v11 = vpop.f32.mrb[7].mxu1 }
 0x103   :  { %v425_v10 = vadd.f32 %v639_v6, %v555_v47  ;;  %v667_v12 = vadd.f32 %v666_v11, %v665_v9  ;;  %v471_v13 = vadd.f32 %v664_v8, %v422_v5 }
 0x105   :  { %v684_v14 = vpop.f32.mrb[8].mxu0  ;;  %v474_v15 = vadd.f32 %v667_v12, %v425_v10 }
 0x106   :  { %v520_v16 = vadd.f32 %v684_v14, %v471_v13  ;;  %v511_v17 = vpop.f32.mrb[9].mxu0 }
 0x107   :  { %v512_v18 = vadd.f32 %v511_v17, %v463_v61  ;;  %v685_v19 = vpop.f32.mrb[10].mxu0 }
 0x108   :  { %v528_v20 = vmax.f32 %v520_v16, 0.0  ;;  %v523_v21 = vadd.f32 %v685_v19, %v474_v15  ;;  %v514_v22 = vpop.f32.mrb[11].mxu0 }
 0x109   :  { %v526_v23 = vmax.f32 %v512_v18, 0.0  ;;  %v515_v24 = vadd.f32 %v514_v22, %v466_v0 }
 0x10a   :  { %v610_v25 = vpack.c.bf16 %v528_v20, %v528_v20  ;;  %v529_v26 = vmax.f32 %v523_v21, 0.0 }
 0x10b   :  { %v608_v27 = vpack.c.bf16 %v526_v23, %v526_v23  ;;  %v527_v28 = vmax.f32 %v515_v24, 0.0 }
 0x10c   :  { %549 = vst.msk [vmem:[%s912_s3 + $0x8] sm:$0xf] %vm546_vm1, %v610_v25  ;;  %v611_v29 = vpack.c.bf16 %v529_v26, %v529_v26 }
 0x10d   :  { %547 = vst.msk [vmem:[%s912_s3] sm:$0xf] %vm546_vm1, %v608_v27  ;;  %v609_v30 = vpack.c.bf16 %v527_v28, %v527_v28 }
 0x10e   :  { %550 = vst.msk [vmem:[%s912_s3 + $0xc] sm:$0xf] %vm546_vm1, %v611_v29 }
 0x10f   :  { %548 = vst.msk [vmem:[%s912_s3 + $0x4] sm:$0xf] %vm546_vm1, %v609_v30 }

// kernel: policy_forward.7
= control target key start
LH: loop header
LB: loop body
LE: loop exit
PB: predicated region body
PF: predicated region fallthrough
CT: control target
= control target key end

     0   :  { %vm1379_vm0 = vcmask 56320   ;;  %s2380_s1 = inlined_call_operand.vmem [shape: bf16[512,512], index: 1, kind: input, shape index: {}]   ;;  %s2381_s0 = inlined_call_operand.vmem [shape: bf16[8,512], index: 0, kind: input, shape index: {}]   ;;  %s2382_s3 = inlined_call_operand.vmem [shape: bf16[512,7], index: 3, kind: input, shape index: {}]   ;;  %s2383_s2 = inlined_call_operand.vmem [shape: f32[1,512], index: 2, kind: input, shape index: {}]   ;;  %s2384_s5 = inlined_call_operand.vmem [shape: f32[8,512], index: 5, kind: output, shape index: {0}]   ;;  %s2385_s4 = inlined_call_operand.vmem [shape: f32[1,7], index: 4, kind: input, shape index: {}]   ;;  %s2386_s6 = inlined_call_operand.vmem [shape: f32[8,7], index: 6, kind: output, shape index: {1}]  }
   0x1   :  { %v1598_v0 = vld [vmem:[%s2380_s1 + $0x4] ss:$16 sps:$4 sm:$0xff]   ;;  %v1602_v2 = vld [vmem:[%s2380_s1] ss:$16 sps:$4 sm:$0xff]   ;;  %v36_v48 = vld [vmem:[%s2381_s0 + $0x8] sm:$0xff] }
   0x2   :  { %v1600_v1 = vld [vmem:[%s2380_s1 + $0x204] ss:$16 sps:$4 sm:$0xff]   ;;  %819 = vmatprep.subr.bf16.mxu0 %v1598_v0  ;;  %v1603_v3 = vld [vmem:[%s2380_s1 + $0x200] ss:$16 sps:$4 sm:$0xff]   ;;  %v1392_v51 = vcombine.high %v36_v48, %v36_v48 }
   0x3   :  { %860 = vmatprep.subr.bf16.mxu1 %v1600_v1  ;;  %v1604_v4 = vld [vmem:[%s2380_s1 + $0x24] ss:$16 sps:$4 sm:$0xff]   ;;  %820 = vmatpush1.bf16.msra.mxu0 %v1602_v2  ;;  %v1608_v6 = vld [vmem:[%s2380_s1 + $0x20] ss:$16 sps:$4 sm:$0xff]  }
   0x4   :  { %861 = vmatpush1.bf16.msra.mxu1 %v1603_v3  ;;  %v1606_v5 = vld [vmem:[%s2380_s1 + $0x224] ss:$16 sps:$4 sm:$0xff]   ;;  %821 = vmatprep.subr.bf16.mxu0 %v1604_v4  ;;  %v1609_v7 = vld [vmem:[%s2380_s1 + $0x220] ss:$16 sps:$4 sm:$0xff]   ;;  %v1700_v4 = vld [vmem:[%s2380_s1 + $0xc] ss:$16 sps:$4 sm:$0xff]  }
   0x5   :  { %862 = vmatprep.subr.bf16.mxu1 %v1606_v5  ;;  %v1610_v8 = vld [vmem:[%s2380_s1 + $0x44] ss:$16 sps:$4 sm:$0xff]   ;;  %v1614_v10 = vld [vmem:[%s2380_s1 + $0x40] ss:$16 sps:$4 sm:$0xff]   ;;  %892 = vmatprep.mubr.bf16.mxu1 %v1392_v51  ;;  %v1703_v5 = vld [vmem:[%s2380_s1 + $0x20c] ss:$16 sps:$4 sm:$0xff]  }
   0x6   :  { %v1612_v9 = vld [vmem:[%s2380_s1 + $0x244] ss:$16 sps:$4 sm:$0xff]   ;;  %v1615_v11 = vld [vmem:[%s2380_s1 + $0x240] ss:$16 sps:$4 sm:$0xff]  }
   0x7   :  { %822 = vmatpush1.bf16.msra.mxu0 %v1608_v6  ;;  %v1616_v12 = vld [vmem:[%s2380_s1 + $0x64] ss:$16 sps:$4 sm:$0xff]   ;;  %v1620_v14 = vld [vmem:[%s2380_s1 + $0x60] ss:$16 sps:$4 sm:$0xff]  }
   0x8   :  { %863 = vmatpush1.bf16.msra.mxu1 %v1609_v7  ;;  %823 = vmatprep.subr.bf16.mxu0 %v1610_v8  ;;  %v1618_v13 = vld [vmem:[%s2380_s1 + $0x264] ss:$16 sps:$4 sm:$0xff]   ;;  %v1621_v15 = vld [vmem:[%s2380_s1 + $0x260] ss:$16 sps:$4 sm:$0xff]   ;;  %v2070_v7 = vcombine.low %v36_v48, %v36_v48  ;;  %v1698_v8 = vld [vmem:[%s2380_s1 + $0x8] ss:$16 sps:$4 sm:$0xff]  }
   0x9   :  { %864 = vmatprep.subr.bf16.mxu1 %v1612_v9  ;;  %v1622_v16 = vld [vmem:[%s2380_s1 + $0x84] ss:$16 sps:$4 sm:$0xff]   ;;  %v1626_v18 = vld [vmem:[%s2380_s1 + $0x80] ss:$16 sps:$4 sm:$0xff]   ;;  %v1701_v9 = vld [vmem:[%s2380_s1 + $0x208] ss:$16 sps:$4 sm:$0xff]  }
   0xa   :  { %v1624_v17 = vld [vmem:[%s2380_s1 + $0x284] ss:$16 sps:$4 sm:$0xff]   ;;  %v1627_v19 = vld [vmem:[%s2380_s1 + $0x280] ss:$16 sps:$4 sm:$0xff]   ;;  %v1758_v48 = vld [vmem:[%s2380_s1 + $0x148] ss:$16 sps:$4 sm:$0xff]  }
   0xb   :  { %824 = vmatpush1.bf16.msra.mxu0 %v1614_v10  ;;  %v1628_v20 = vld [vmem:[%s2380_s1 + $0xa4] ss:$16 sps:$4 sm:$0xff]   ;;  %v1632_v22 = vld [vmem:[%s2380_s1 + $0xa0] ss:$16 sps:$4 sm:$0xff]   ;;  %v1706_v10 = vld [vmem:[%s2380_s1 + $0x2c] ss:$16 sps:$4 sm:$0xff]  }
   0xc   :  { %865 = vmatpush1.bf16.msra.mxu1 %v1615_v11  ;;  %825 = vmatprep.subr.bf16.mxu0 %v1616_v12  ;;  %v1630_v21 = vld [vmem:[%s2380_s1 + $0x2a4] ss:$16 sps:$4 sm:$0xff]   ;;  %v1633_v23 = vld [vmem:[%s2380_s1 + $0x2a0] ss:$16 sps:$4 sm:$0xff]   ;;  %v1709_v11 = vld [vmem:[%s2380_s1 + $0x22c] ss:$16 sps:$4 sm:$0xff]  }
   0xd   :  { %866 = vmatprep.subr.bf16.mxu1 %v1618_v13  ;;  %v1634_v24 = vld [vmem:[%s2380_s1 + $0xc4] ss:$16 sps:$4 sm:$0xff]   ;;  %v1638_v26 = vld [vmem:[%s2380_s1 + $0xc0] ss:$16 sps:$4 sm:$0xff]   ;;  %v1704_v12 = vld [vmem:[%s2380_s1 + $0x28] ss:$16 sps:$4 sm:$0xff]  }
   0xe   :  { %v1636_v25 = vld [vmem:[%s2380_s1 + $0x2c4] ss:$16 sps:$4 sm:$0xff]   ;;  %v1639_v27 = vld [vmem:[%s2380_s1 + $0x2c0] ss:$16 sps:$4 sm:$0xff]   ;;  %v1707_v13 = vld [vmem:[%s2380_s1 + $0x228] ss:$16 sps:$4 sm:$0xff]  }
   0xf   :  { %826 = vmatpush1.bf16.msra.mxu0 %v1620_v14  ;;  %v1640_v28 = vld [vmem:[%s2380_s1 + $0xe4] ss:$16 sps:$4 sm:$0xff]   ;;  %v1644_v30 = vld [vmem:[%s2380_s1 + $0xe0] ss:$16 sps:$4 sm:$0xff]   ;;  %v1712_v14 = vld [vmem:[%s2380_s1 + $0x4c] ss:$16 sps:$4 sm:$0xff]  }
  0x10   :  { %867 = vmatpush1.bf16.msra.mxu1 %v1621_v15  ;;  %827 = vmatprep.subr.bf16.mxu0 %v1622_v16  ;;  %v1642_v29 = vld [vmem:[%s2380_s1 + $0x2e4] ss:$16 sps:$4 sm:$0xff]   ;;  %v1645_v31 = vld [vmem:[%s2380_s1 + $0x2e0] ss:$16 sps:$4 sm:$0xff]   ;;  %v1715_v15 = vld [vmem:[%s2380_s1 + $0x24c] ss:$16 sps:$4 sm:$0xff]  }
  0x11   :  { %868 = vmatprep.subr.bf16.mxu1 %v1624_v17  ;;  %v1646_v32 = vld [vmem:[%s2380_s1 + $0x104] ss:$16 sps:$4 sm:$0xff]   ;;  %v1650_v34 = vld [vmem:[%s2380_s1 + $0x100] ss:$16 sps:$4 sm:$0xff]   ;;  %v1710_v16 = vld [vmem:[%s2380_s1 + $0x48] ss:$16 sps:$4 sm:$0xff]  }
  0x12   :  { %v1648_v33 = vld [vmem:[%s2380_s1 + $0x304] ss:$16 sps:$4 sm:$0xff]   ;;  %v1651_v35 = vld [vmem:[%s2380_s1 + $0x300] ss:$16 sps:$4 sm:$0xff]   ;;  %v1713_v17 = vld [vmem:[%s2380_s1 + $0x248] ss:$16 sps:$4 sm:$0xff]  }
  0x13   :  { %828 = vmatpush1.bf16.msra.mxu0 %v1626_v18  ;;  %v1652_v36 = vld [vmem:[%s2380_s1 + $0x124] ss:$16 sps:$4 sm:$0xff]   ;;  %v1656_v38 = vld [vmem:[%s2380_s1 + $0x120] ss:$16 sps:$4 sm:$0xff]   ;;  %v1718_v18 = vld [vmem:[%s2380_s1 + $0x6c] ss:$16 sps:$4 sm:$0xff]  }
  0x14   :  { %869 = vmatpush1.bf16.msra.mxu1 %v1627_v19  ;;  %829 = vmatprep.subr.bf16.mxu0 %v1628_v20  ;;  %v1654_v37 = vld [vmem:[%s2380_s1 + $0x324] ss:$16 sps:$4 sm:$0xff]   ;;  %v1657_v39 = vld [vmem:[%s2380_s1 + $0x320] ss:$16 sps:$4 sm:$0xff]   ;;  %v1721_v19 = vld [vmem:[%s2380_s1 + $0x26c] ss:$16 sps:$4 sm:$0xff]  }
  0x15   :  { %870 = vmatprep.subr.bf16.mxu1 %v1630_v21  ;;  %v1658_v40 = vld [vmem:[%s2380_s1 + $0x144] ss:$16 sps:$4 sm:$0xff]   ;;  %v1662_v42 = vld [vmem:[%s2380_s1 + $0x140] ss:$16 sps:$4 sm:$0xff]   ;;  %v1716_v20 = vld [vmem:[%s2380_s1 + $0x68] ss:$16 sps:$4 sm:$0xff]  }
  0x16   :  { %v1660_v41 = vld [vmem:[%s2380_s1 + $0x344] ss:$16 sps:$4 sm:$0xff]   ;;  %v1663_v43 = vld [vmem:[%s2380_s1 + $0x340] ss:$16 sps:$4 sm:$0xff]   ;;  %v1719_v21 = vld [vmem:[%s2380_s1 + $0x268] ss:$16 sps:$4 sm:$0xff]  }
  0x17   :  { %830 = vmatpush1.bf16.msra.mxu0 %v1632_v22  ;;  %v1664_v44 = vld [vmem:[%s2380_s1 + $0x164] ss:$16 sps:$4 sm:$0xff]   ;;  %v1668_v49 = vld [vmem:[%s2380_s1 + $0x160] ss:$16 sps:$4 sm:$0xff]   ;;  %v1724_v22 = vld [vmem:[%s2380_s1 + $0x8c] ss:$16 sps:$4 sm:$0xff]  }
  0x18   :  { %871 = vmatpush1.bf16.msra.mxu1 %v1633_v23  ;;  %831 = vmatprep.subr.bf16.mxu0 %v1634_v24  ;;  %v1666_v45 = vld [vmem:[%s2380_s1 + $0x364] ss:$16 sps:$4 sm:$0xff]   ;;  %v1669_v50 = vld [vmem:[%s2380_s1 + $0x360] ss:$16 sps:$4 sm:$0xff]   ;;  %v1727_v23 = vld [vmem:[%s2380_s1 + $0x28c] ss:$16 sps:$4 sm:$0xff]  }
  0x19   :  { %872 = vmatprep.subr.bf16.mxu1 %v1636_v25  ;;  %v35_v46 = vld [vmem:[%s2381_s0] sm:$0xff]  ;;  %v1722_v24 = vld [vmem:[%s2380_s1 + $0x88] ss:$16 sps:$4 sm:$0xff]  }
  0x1a   :  { %v2002_v47 = vcombine.high %v35_v46, %v35_v46  ;;  %v1670_v52 = vld [vmem:[%s2380_s1 + $0x184] ss:$16 sps:$4 sm:$0xff]   ;;  %v1674_v54 = vld [vmem:[%s2380_s1 + $0x180] ss:$16 sps:$4 sm:$0xff]   ;;  %v2068_v6 = vcombine.low %v35_v46, %v35_v46  ;;  %v1725_v25 = vld [vmem:[%s2380_s1 + $0x288] ss:$16 sps:$4 sm:$0xff]  }
  0x1b   :  { %832 = vmatpush1.bf16.msra.mxu0 %v1638_v26  ;;  %v1672_v53 = vld [vmem:[%s2380_s1 + $0x384] ss:$16 sps:$4 sm:$0xff]   ;;  %v1675_v55 = vld [vmem:[%s2380_s1 + $0x380] ss:$16 sps:$4 sm:$0xff]   ;;  %v1730_v26 = vld [vmem:[%s2380_s1 + $0xac] ss:$16 sps:$4 sm:$0xff]  }
  0x1c   :  { %873 = vmatpush1.bf16.msra.mxu1 %v1639_v27  ;;  %833 = vmatprep.subr.bf16.mxu0 %v1640_v28  ;;  %v1676_v56 = vld [vmem:[%s2380_s1 + $0x1a4] ss:$16 sps:$4 sm:$0xff]   ;;  %v1680_v58 = vld [vmem:[%s2380_s1 + $0x1a0] ss:$16 sps:$4 sm:$0xff]   ;;  %v1733_v27 = vld [vmem:[%s2380_s1 + $0x2ac] ss:$16 sps:$4 sm:$0xff]  }
  0x1d   :  { %874 = vmatprep.subr.bf16.mxu1 %v1642_v29  ;;  %851 = vmatprep.mubr.bf16.mxu0 %v2002_v47  ;;  %v1678_v57 = vld [vmem:[%s2380_s1 + $0x3a4] ss:$16 sps:$4 sm:$0xff]   ;;  %v1681_v59 = vld [vmem:[%s2380_s1 + $0x3a0] ss:$16 sps:$4 sm:$0xff]   ;;  %v1728_v28 = vld [vmem:[%s2380_s1 + $0xa8] ss:$16 sps:$4 sm:$0xff]  }
  0x1e   :  { %v1682_v60 = vld [vmem:[%s2380_s1 + $0x1c4] ss:$16 sps:$4 sm:$0xff]   ;;  %v1686_v62 = vld [vmem:[%s2380_s1 + $0x1c0] ss:$16 sps:$4 sm:$0xff]   ;;  %v1731_v29 = vld [vmem:[%s2380_s1 + $0x2a8] ss:$16 sps:$4 sm:$0xff]  }
  0x1f   :  { %834 = vmatpush1.bf16.msra.mxu0 %v1644_v30  ;;  %v1684_v61 = vld [vmem:[%s2380_s1 + $0x3c4] ss:$16 sps:$4 sm:$0xff]   ;;  %v1687_v63 = vld [vmem:[%s2380_s1 + $0x3c0] ss:$16 sps:$4 sm:$0xff]   ;;  %v1736_v30 = vld [vmem:[%s2380_s1 + $0xcc] ss:$16 sps:$4 sm:$0xff]  }
  0x20   :  { %875 = vmatpush1.bf16.msra.mxu1 %v1645_v31  ;;  %835 = vmatprep.subr.bf16.mxu0 %v1646_v32  ;;  %v1688_v0 = vld [vmem:[%s2380_s1 + $0x1e4] ss:$16 sps:$4 sm:$0xff]   ;;  %v1692_v2 = vld [vmem:[%s2380_s1 + $0x1e0] ss:$16 sps:$4 sm:$0xff]   ;;  %v1739_v31 = vld [vmem:[%s2380_s1 + $0x2cc] ss:$16 sps:$4 sm:$0xff]  }
  0x21   :  { %876 = vmatprep.subr.bf16.mxu1 %v1648_v33  ;;  %v1690_v1 = vld [vmem:[%s2380_s1 + $0x3e4] ss:$16 sps:$4 sm:$0xff]   ;;  %v1693_v3 = vld [vmem:[%s2380_s1 + $0x3e0] ss:$16 sps:$4 sm:$0xff]   ;;  %v1734_v32 = vld [vmem:[%s2380_s1 + $0xc8] ss:$16 sps:$4 sm:$0xff]  }
  0x22   :  { %v1737_v33 = vld [vmem:[%s2380_s1 + $0x2c8] ss:$16 sps:$4 sm:$0xff]   ;;  %v1760_v46 = vld [vmem:[%s2380_s1 + $0x14c] ss:$16 sps:$4 sm:$0xff]  }
  0x23   :  { %836 = vmatpush1.bf16.msra.mxu0 %v1650_v34  ;;  %v1742_v34 = vld [vmem:[%s2380_s1 + $0xec] ss:$16 sps:$4 sm:$0xff]  }
  0x24   :  { %877 = vmatpush1.bf16.msra.mxu1 %v1651_v35  ;;  %837 = vmatprep.subr.bf16.mxu0 %v1652_v36  ;;  %v1745_v35 = vld [vmem:[%s2380_s1 + $0x2ec] ss:$16 sps:$4 sm:$0xff]   ;;  %v1740_v36 = vld [vmem:[%s2380_s1 + $0xe8] ss:$16 sps:$4 sm:$0xff]  }
  0x25   :  { %878 = vmatprep.subr.bf16.mxu1 %v1654_v37  ;;  %v1743_v37 = vld [vmem:[%s2380_s1 + $0x2e8] ss:$16 sps:$4 sm:$0xff]  }
  0x27   :  { %838 = vmatpush1.bf16.msra.mxu0 %v1656_v38  ;;  %v1748_v38 = vld [vmem:[%s2380_s1 + $0x10c] ss:$16 sps:$4 sm:$0xff]  }
  0x28   :  { %879 = vmatpush1.bf16.msra.mxu1 %v1657_v39  ;;  %839 = vmatprep.subr.bf16.mxu0 %v1658_v40  ;;  %v1751_v39 = vld [vmem:[%s2380_s1 + $0x30c] ss:$16 sps:$4 sm:$0xff]   ;;  %v1746_v40 = vld [vmem:[%s2380_s1 + $0x108] ss:$16 sps:$4 sm:$0xff]  }
  0x29   :  { %880 = vmatprep.subr.bf16.mxu1 %v1660_v41  ;;  %v1749_v41 = vld [vmem:[%s2380_s1 + $0x308] ss:$16 sps:$4 sm:$0xff]  }
  0x2b   :  { %840 = vmatpush1.bf16.msra.mxu0 %v1662_v42  ;;  %v1754_v42 = vld [vmem:[%s2380_s1 + $0x12c] ss:$16 sps:$4 sm:$0xff]  }
  0x2c   :  { %881 = vmatpush1.bf16.msra.mxu1 %v1663_v43  ;;  %841 = vmatprep.subr.bf16.mxu0 %v1664_v44  ;;  %v1757_v43 = vld [vmem:[%s2380_s1 + $0x32c] ss:$16 sps:$4 sm:$0xff]   ;;  %v1752_v44 = vld [vmem:[%s2380_s1 + $0x128] ss:$16 sps:$4 sm:$0xff]  }
  0x2d   :  { %882 = vmatprep.subr.bf16.mxu1 %v1666_v45  ;;  %v1755_v45 = vld [vmem:[%s2380_s1 + $0x328] ss:$16 sps:$4 sm:$0xff]  }
  0x2f   :  { %842 = vmatpush1.bf16.msra.mxu0 %v1668_v49  ;;  %v1761_v49 = vld [vmem:[%s2380_s1 + $0x348] ss:$16 sps:$4 sm:$0xff]  }
  0x30   :  { %883 = vmatpush1.bf16.msra.mxu1 %v1669_v50  ;;  %843 = vmatprep.subr.bf16.mxu0 %v1670_v52  ;;  %v1766_v50 = vld [vmem:[%s2380_s1 + $0x16c] ss:$16 sps:$4 sm:$0xff]   ;;  %v1764_v52 = vld [vmem:[%s2380_s1 + $0x168] ss:$16 sps:$4 sm:$0xff]  }
  0x31   :  { %884 = vmatprep.subr.bf16.mxu1 %v1672_v53  ;;  %v1767_v53 = vld [vmem:[%s2380_s1 + $0x368] ss:$16 sps:$4 sm:$0xff]  }
  0x33   :  { %844 = vmatpush1.bf16.msra.mxu0 %v1674_v54  ;;  %v1772_v54 = vld [vmem:[%s2380_s1 + $0x18c] ss:$16 sps:$4 sm:$0xff]  }
  0x34   :  { %885 = vmatpush1.bf16.msra.mxu1 %v1675_v55  ;;  %845 = vmatprep.subr.bf16.mxu0 %v1676_v56  ;;  %v1775_v55 = vld [vmem:[%s2380_s1 + $0x38c] ss:$16 sps:$4 sm:$0xff]   ;;  %v1770_v56 = vld [vmem:[%s2380_s1 + $0x188] ss:$16 sps:$4 sm:$0xff]  }
  0x35   :  { %886 = vmatprep.subr.bf16.mxu1 %v1678_v57  ;;  %v1773_v57 = vld [vmem:[%s2380_s1 + $0x388] ss:$16 sps:$4 sm:$0xff]  }
  0x37   :  { %846 = vmatpush1.bf16.msra.mxu0 %v1680_v58  ;;  %v1778_v58 = vld [vmem:[%s2380_s1 + $0x1ac] ss:$16 sps:$4 sm:$0xff]  }
  0x38   :  { %887 = vmatpush1.bf16.msra.mxu1 %v1681_v59  ;;  %847 = vmatprep.subr.bf16.mxu0 %v1682_v60  ;;  %v1781_v59 = vld [vmem:[%s2380_s1 + $0x3ac] ss:$16 sps:$4 sm:$0xff]   ;;  %v1776_v60 = vld [vmem:[%s2380_s1 + $0x1a8] ss:$16 sps:$4 sm:$0xff]  }
  0x39   :  { %888 = vmatprep.subr.bf16.mxu1 %v1684_v61  ;;  %v1779_v61 = vld [vmem:[%s2380_s1 + $0x3a8] ss:$16 sps:$4 sm:$0xff]  }
  0x3b   :  { %848 = vmatpush1.bf16.msra.mxu0 %v1686_v62  ;;  %v1784_v62 = vld [vmem:[%s2380_s1 + $0x1cc] ss:$16 sps:$4 sm:$0xff]  }
  0x3c   :  { %889 = vmatpush1.bf16.msra.mxu1 %v1687_v63  ;;  %849 = vmatprep.subr.bf16.mxu0 %v1688_v0  ;;  %v1787_v63 = vld [vmem:[%s2380_s1 + $0x3cc] ss:$16 sps:$4 sm:$0xff]   ;;  %v1782_v0 = vld [vmem:[%s2380_s1 + $0x1c8] ss:$16 sps:$4 sm:$0xff]  }
  0x3d   :  { %890 = vmatprep.subr.bf16.mxu1 %v1690_v1  ;;  %v1785_v1 = vld [vmem:[%s2380_s1 + $0x3c8] ss:$16 sps:$4 sm:$0xff]  }
  0x3f   :  { %850 = vmatpush1.bf16.msra.mxu0 %v1692_v2  ;;  %v1790_v2 = vld [vmem:[%s2380_s1 + $0x1ec] ss:$16 sps:$4 sm:$0xff]  }
  0x40   :  { %891 = vmatpush1.bf16.msra.mxu1 %v1693_v3  ;;  %901 = vmatprep.subr.bf16.mxu0 %v1700_v4  ;;  %v1793_v3 = vld [vmem:[%s2380_s1 + $0x3ec] ss:$16 sps:$4 sm:$0xff]   ;;  %v1788_v4 = vld [vmem:[%s2380_s1 + $0x1e8] ss:$16 sps:$4 sm:$0xff]  }
  0x41   :  { %942 = vmatprep.subr.bf16.mxu1 %v1703_v5  ;;  %v1791_v5 = vld [vmem:[%s2380_s1 + $0x3e8] ss:$16 sps:$4 sm:$0xff]  }
  0x42   :  { %852 = vmatmul.mubr.bf16.vlgmr.msra.gmra.mrb[0].mxu0 %v2068_v6 }
  0x43   :  { %893 = vmatmul.mubr.bf16.vlgmr.msra.gmra.mrb[0].mxu1 %v2070_v7  ;;  %902 = vmatpush1.bf16.msra.mxu0 %v1698_v8  ;;  %v1794_v8 = vld [vmem:[%s2382_s3 + $0x40] sm:$0xff]  }
  0x44   :  { %943 = vmatpush1.bf16.msra.mxu1 %v1701_v9  ;;  %903 = vmatprep.subr.bf16.mxu0 %v1706_v10  ;;  %v1795_v9 = vld [vmem:[%s2382_s3] sm:$0xff]   ;;  %v1796_v10 = vld [vmem:[%s2382_s3 + $0x48] sm:$0xff]  }
  0x45   :  { %944 = vmatprep.subr.bf16.mxu1 %v1709_v11  ;;  %933 = vmatprep.mubr.bf16.mxu0 %v2002_v47  ;;  %v1763_v47 = vld [vmem:[%s2380_s1 + $0x34c] ss:$16 sps:$4 sm:$0xff]  }
  0x46   :  { %974 = vmatprep.mubr.bf16.mxu1 %v1392_v51  ;;  %v1769_v51 = vld [vmem:[%s2380_s1 + $0x36c] ss:$16 sps:$4 sm:$0xff]  }
  0x47   :  { %904 = vmatpush1.bf16.msra.mxu0 %v1704_v12  ;;  %v1797_v11 = vld [vmem:[%s2382_s3 + $0x8] sm:$0xff]   ;;  %v1798_v12 = vld [vmem:[%s2382_s3 + $0x50] sm:$0xff]  }
  0x48   :  { %945 = vmatpush1.bf16.msra.mxu1 %v1707_v13  ;;  %905 = vmatprep.subr.bf16.mxu0 %v1712_v14  ;;  %v1799_v13 = vld [vmem:[%s2382_s3 + $0x10] sm:$0xff]   ;;  %v1802_v14 = vld [vmem:[%s2382_s3 + $0x60] sm:$0xff]  }
  0x49   :  { %946 = vmatprep.subr.bf16.mxu1 %v1715_v15  ;;  %v1803_v15 = vld [vmem:[%s2382_s3 + $0x20] sm:$0xff]  }
  0x4b   :  { %906 = vmatpush1.bf16.msra.mxu0 %v1710_v16  ;;  %v1804_v16 = vld [vmem:[%s2382_s3 + $0x68] sm:$0xff]  }
  0x4c   :  { %947 = vmatpush1.bf16.msra.mxu1 %v1713_v17  ;;  %907 = vmatprep.subr.bf16.mxu0 %v1718_v18  ;;  %v1805_v17 = vld [vmem:[%s2382_s3 + $0x28] sm:$0xff]   ;;  %v1806_v18 = vld [vmem:[%s2382_s3 + $0x70] sm:$0xff]  }
  0x4d   :  { %948 = vmatprep.subr.bf16.mxu1 %v1721_v19  ;;  %v1807_v19 = vld [vmem:[%s2382_s3 + $0x30] sm:$0xff]  }
  0x4f   :  { %908 = vmatpush1.bf16.msra.mxu0 %v1716_v20  ;;  %v1808_v20 = vld [vmem:[%s2382_s3 + $0x78] sm:$0xff]  }
  0x50   :  { %949 = vmatpush1.bf16.msra.mxu1 %v1719_v21  ;;  %909 = vmatprep.subr.bf16.mxu0 %v1724_v22  ;;  %v1809_v21 = vld [vmem:[%s2382_s3 + $0x38] sm:$0xff]   ;;  %v1810_v22 = vld [vmem:[%s2382_s3 + $0xc0] sm:$0xff]  }
  0x51   :  { %950 = vmatprep.subr.bf16.mxu1 %v1727_v23  ;;  %v1811_v23 = vld [vmem:[%s2382_s3 + $0x80] sm:$0xff]  }
  0x53   :  { %910 = vmatpush1.bf16.msra.mxu0 %v1722_v24  ;;  %v1812_v24 = vld [vmem:[%s2382_s3 + $0xc8] sm:$0xff]  }
  0x54   :  { %951 = vmatpush1.bf16.msra.mxu1 %v1725_v25  ;;  %911 = vmatprep.subr.bf16.mxu0 %v1730_v26  ;;  %v1813_v25 = vld [vmem:[%s2382_s3 + $0x88] sm:$0xff]   ;;  %v1814_v26 = vld [vmem:[%s2382_s3 + $0xd0] sm:$0xff]  }
  0x55   :  { %952 = vmatprep.subr.bf16.mxu1 %v1733_v27  ;;  %v1815_v27 = vld [vmem:[%s2382_s3 + $0x90] sm:$0xff]  }
  0x57   :  { %912 = vmatpush1.bf16.msra.mxu0 %v1728_v28  ;;  %v1816_v28 = vld [vmem:[%s2382_s3 + $0xd8] sm:$0xff]  }
  0x58   :  { %953 = vmatpush1.bf16.msra.mxu1 %v1731_v29  ;;  %913 = vmatprep.subr.bf16.mxu0 %v1736_v30  ;;  %v1817_v29 = vld [vmem:[%s2382_s3 + $0x98] sm:$0xff]   ;;  %v1818_v30 = vld [vmem:[%s2382_s3 + $0xe0] sm:$0xff]  }
  0x59   :  { %954 = vmatprep.subr.bf16.mxu1 %v1739_v31  ;;  %v1819_v31 = vld [vmem:[%s2382_s3 + $0xa0] sm:$0xff]  }
  0x5b   :  { %914 = vmatpush1.bf16.msra.mxu0 %v1734_v32  ;;  %v1820_v32 = vld [vmem:[%s2382_s3 + $0xe8] sm:$0xff]  }
  0x5c   :  { %955 = vmatpush1.bf16.msra.mxu1 %v1737_v33  ;;  %915 = vmatprep.subr.bf16.mxu0 %v1742_v34  ;;  %v1000_v33 = vlaneseq }
  0x5d   :  { %956 = vmatprep.subr.bf16.mxu1 %v1745_v35  ;;  %v1821_v35 = vld [vmem:[%s2382_s3 + $0xa8] sm:$0xff]  }
  0x5e   :  { %v1001_v34 = vshrl.u32 %v1000_v33, 7 }
  0x5f   :  { %916 = vmatpush1.bf16.msra.mxu0 %v1740_v36 }
  0x60   :  { %957 = vmatpush1.bf16.msra.mxu1 %v1743_v37  ;;  %917 = vmatprep.subr.bf16.mxu0 %v1748_v38  ;;  %v1010_v36 = vsub.s32 2, %v1001_v34  ;;  %v998_v37 = vld [vmem:[%s2383_s2] sm:$0xf]  ;;  %v1014_v38 = vsub.s32 3, %v1001_v34 }
  0x61   :  { %958 = vmatprep.subr.bf16.mxu1 %v1751_v39 }
  0x62   :  { %v1011_v39 = vrot.slane %v998_v37, %v1010_v36 }
  0x63   :  { %918 = vmatpush1.bf16.msra.mxu0 %v1746_v40  ;;  %v1822_v40 = vld [vmem:[%s2382_s3 + $0xf0] sm:$0xff]  }
  0x64   :  { %959 = vmatpush1.bf16.msra.mxu1 %v1749_v41  ;;  %919 = vmatprep.subr.bf16.mxu0 %v1754_v42  ;;  %v1015_v41 = vrot.slane %v998_v37, %v1014_v38  ;;  %v1823_v42 = vld [vmem:[%s2382_s3 + $0xb0] sm:$0xff]  }
  0x65   :  { %960 = vmatprep.subr.bf16.mxu1 %v1757_v43  ;;  %v1824_v43 = vld [vmem:[%s2382_s3 + $0xf8] sm:$0xff]  }
  0x67   :  { %920 = vmatpush1.bf16.msra.mxu0 %v1752_v44  ;;  %v1825_v44 = vld [vmem:[%s2382_s3 + $0xb8] sm:$0xff]  }
  0x68   :  { %961 = vmatpush1.bf16.msra.mxu1 %v1755_v45  ;;  %921 = vmatprep.subr.bf16.mxu0 %v1760_v46  ;;  %v1002_v45 = vsub.s32 0, %v1001_v34  ;;  %v1006_v46 = vsub.s32 1, %v1001_v34 }
  0x69   :  { %962 = vmatprep.subr.bf16.mxu1 %v1763_v47 }
  0x6a   :  { %v1003_v47 = vrot.slane %v998_v37, %v1002_v45 }
  0x6b   :  { %922 = vmatpush1.bf16.msra.mxu0 %v1758_v48 }
  0x6c   :  { %963 = vmatpush1.bf16.msra.mxu1 %v1761_v49  ;;  %923 = vmatprep.subr.bf16.mxu0 %v1766_v50  ;;  %v1007_v50 = vrot.slane %v998_v37, %v1006_v46 }
  0x6d   :  { %964 = vmatprep.subr.bf16.mxu1 %v1769_v51 }
  0x6f   :  { %924 = vmatpush1.bf16.msra.mxu0 %v1764_v52 }
  0x70   :  { %965 = vmatpush1.bf16.msra.mxu1 %v1767_v53  ;;  %925 = vmatprep.subr.bf16.mxu0 %v1772_v54 }
  0x71   :  { %966 = vmatprep.subr.bf16.mxu1 %v1775_v55 }
  0x73   :  { %926 = vmatpush1.bf16.msra.mxu0 %v1770_v56 }
  0x74   :  { %967 = vmatpush1.bf16.msra.mxu1 %v1773_v57  ;;  %927 = vmatprep.subr.bf16.mxu0 %v1778_v58 }
  0x75   :  { %968 = vmatprep.subr.bf16.mxu1 %v1781_v59 }
  0x77   :  { %928 = vmatpush1.bf16.msra.mxu0 %v1776_v60 }
  0x78   :  { %969 = vmatpush1.bf16.msra.mxu1 %v1779_v61  ;;  %929 = vmatprep.subr.bf16.mxu0 %v1784_v62 }
  0x79   :  { %970 = vmatprep.subr.bf16.mxu1 %v1787_v63 }
  0x7b   :  { %930 = vmatpush1.bf16.msra.mxu0 %v1782_v0 }
  0x7c   :  { %971 = vmatpush1.bf16.msra.mxu1 %v1785_v1  ;;  %931 = vmatprep.subr.bf16.mxu0 %v1790_v2 }
  0x7d   :  { %972 = vmatprep.subr.bf16.mxu1 %v1793_v3 }
  0x7f   :  { %932 = vmatpush1.bf16.msra.mxu0 %v1788_v4 }
  0x80   :  { %973 = vmatpush1.bf16.msra.mxu1 %v1791_v5  ;;  %1554 = vmatprep.subr.bf16.mxu0 %v1794_v8 }
  0x81   :  { %1576 = vmatprep.subr.bf16.mxu1 %v1810_v22  ;;  %v1521_v22 = vld [vmem:[%s2385_s4] ss:$0 sm:$0xff] }
  0x82   :  { %934 = vmatmul.mubr.bf16.vlgmr.msra.gmra.mrb[4].mxu0 %v2068_v6  ;;  %v1800_v6 = vld [vmem:[%s2382_s3 + $0x58] sm:$0xff]  }
  0x83   :  { %975 = vmatmul.mubr.bf16.vlgmr.msra.gmra.mrb[4].mxu1 %v2070_v7  ;;  %1555 = vmatpush3.bf16.msra.mxu0 %v1795_v9  ;;  %v1801_v7 = vld [vmem:[%s2382_s3 + $0x18] sm:$0xff]  }
  0x84   :  { %1556 = vmatprep.subr.bf16.mxu0 %v1796_v10  ;;  %1577 = vmatpush3.bf16.msra.mxu1 %v1811_v23 }
  0x85   :  { %1578 = vmatprep.subr.bf16.mxu1 %v1812_v24 }
  0x87   :  { %1557 = vmatpush3.bf16.msra.mxu0 %v1797_v11 }
  0x88   :  { %1558 = vmatprep.subr.bf16.mxu0 %v1798_v12  ;;  %1579 = vmatpush3.bf16.msra.mxu1 %v1813_v25 }
  0x89   :  { %1580 = vmatprep.subr.bf16.mxu1 %v1814_v26 }
  0x8b   :  { %1559 = vmatpush3.bf16.msra.mxu0 %v1799_v13 }
  0x8c   :  { %1560 = vmatprep.subr.bf16.mxu0 %v1800_v6  ;;  %1581 = vmatpush3.bf16.msra.mxu1 %v1815_v27 }
  0x8d   :  { %1582 = vmatprep.subr.bf16.mxu1 %v1816_v28 }
  0x8f   :  { %1561 = vmatpush3.bf16.msra.mxu0 %v1801_v7 }
  0x90   :  { %1562 = vmatprep.subr.bf16.mxu0 %v1802_v14  ;;  %1583 = vmatpush3.bf16.msra.mxu1 %v1817_v29 }
  0x91   :  { %1584 = vmatprep.subr.bf16.mxu1 %v1818_v30 }
  0x93   :  { %1563 = vmatpush3.bf16.msra.mxu0 %v1803_v15 }
  0x94   :  { %1564 = vmatprep.subr.bf16.mxu0 %v1804_v16  ;;  %1585 = vmatpush3.bf16.msra.mxu1 %v1819_v31 }
  0x95   :  { %1586 = vmatprep.subr.bf16.mxu1 %v1820_v32 }
  0x97   :  { %1565 = vmatpush3.bf16.msra.mxu0 %v1805_v17 }
  0x98   :  { %1566 = vmatprep.subr.bf16.mxu0 %v1806_v18  ;;  %1587 = vmatpush3.bf16.msra.mxu1 %v1821_v35 }
  0x99   :  { %1588 = vmatprep.subr.bf16.mxu1 %v1822_v40 }
  0x9b   :  { %1567 = vmatpush3.bf16.msra.mxu0 %v1807_v19 }
  0x9c   :  { %1568 = vmatprep.subr.bf16.mxu0 %v1808_v20  ;;  %1589 = vmatpush3.bf16.msra.mxu1 %v1823_v42 }
  0x9d   :  { %1590 = vmatprep.subr.bf16.mxu1 %v1824_v43 }
  0x9f   :  { %1569 = vmatpush3.bf16.msra.mxu0 %v1809_v21 }
  0xa0   :  { %1591 = vmatpush3.bf16.msra.mxu1 %v1825_v44 }
 0x115   :  { %v853_v48 = vpop.f32.mrb[0].mxu0 }
 0x116   :  { %v894_v49 = vpop.f32.mrb[0].mxu1  ;;  %v855_v52 = vpop.f32.mrb[1].mxu0 }
 0x117   :  { %v895_v51 = vadd.f32 %v894_v49, %v853_v48  ;;  %v896_v53 = vpop.f32.mrb[1].mxu1  ;;  %v857_v55 = vpop.f32.mrb[2].mxu0 }
 0x118   :  { %v897_v54 = vadd.f32 %v896_v53, %v855_v52  ;;  %v898_v56 = vpop.f32.mrb[2].mxu1  ;;  %v858_v58 = vpop.f32.mrb[3].mxu0 }
 0x119   :  { %v1020_v57 = vadd.f32 %v1003_v47, %v895_v51  ;;  %v899_v59 = vpop.f32.mrb[3].mxu1 }
 0x11a   :  { %v1021_v60 = vadd.f32 %v1007_v50, %v897_v54 }
 0x11b   :  { %v1024_v61 = vmax.f32 %v1020_v57, 0.0 }
 0x11c   :  { %v1025_v62 = vmax.f32 %v1021_v60, 0.0 }
 0x11d   :  { %1028 = vst [vmem:[%s2384_s5] sm:$0xff] %v1024_v61  ;;  %v1032_v63 = vpack.c.bf16 %v1024_v61, %v1024_v61 }
 0x11e   :  { %1029 = vst [vmem:[%s2384_s5 + $0x8] sm:$0xff] %v1025_v62  ;;  %v1033_v0 = vpack.c.bf16 %v1025_v62, %v1025_v62 }
 0x120   :  { %1331 = vmatprep.mubr.bf16.mxu0 %v1033_v0 }
 0x121   :  { %1332 = vmatmul.mubr.bf16.vlgmr.msra.gmra.mrb[8].mxu0 %v1032_v63 }
 0x155   :  { %v935_v1 = vpop.f32.mrb[4].mxu0 }
 0x156   :  { %v976_v2 = vpop.f32.mrb[4].mxu1  ;;  %v937_v4 = vpop.f32.mrb[5].mxu0 }
 0x157   :  { %v977_v3 = vadd.f32 %v976_v2, %v935_v1  ;;  %v978_v5 = vpop.f32.mrb[5].mxu1  ;;  %v939_v9 = vpop.f32.mrb[6].mxu0 }
 0x158   :  { %v979_v8 = vadd.f32 %v978_v5, %v937_v4  ;;  %v980_v10 = vpop.f32.mrb[6].mxu1  ;;  %v940_v12 = vpop.f32.mrb[7].mxu0 }
 0x159   :  { %v1022_v11 = vadd.f32 %v1011_v39, %v977_v3  ;;  %v981_v13 = vpop.f32.mrb[7].mxu1 }
 0x15a   :  { %v1023_v6 = vadd.f32 %v1015_v41, %v979_v8 }
 0x15b   :  { %v1026_v7 = vmax.f32 %v1022_v11, 0.0 }
 0x15c   :  { %v1027_v14 = vmax.f32 %v1023_v6, 0.0 }
 0x15d   :  { %1030 = vst [vmem:[%s2384_s5 + $0x10] sm:$0xff] %v1026_v7  ;;  %v1034_v16 = vpack.c.bf16 %v1026_v7, %v1026_v7 }
 0x15e   :  { %1031 = vst [vmem:[%s2384_s5 + $0x18] sm:$0xff] %v1027_v14  ;;  %v1035_v15 = vpack.c.bf16 %v1027_v14, %v1027_v14 }
 0x160   :  { %1371 = vmatprep.mubr.bf16.mxu1 %v1035_v15 }
 0x161   :  { %1372 = vmatmul.mubr.bf16.vlgmr.msra.gmra.mrb[8].mxu1 %v1034_v16 }
 0x1f4   :  { %v1570_v17 = vpop.f32.mrb[8].mxu0 }
 0x1f5   :  { %v1571_v18 = vpop.f32.mrb[9].mxu0 }
 0x1f6   :  { %v1572_v19 = vadd.f32 %v1571_v18, %v1570_v17  ;;  %v1573_v20 = vpop.f32.mrb[10].mxu0 }
 0x1f7   :  { %v1574_v21 = vpop.f32.mrb[11].mxu0 }
 0x1f8   :  { %v1334_v25 = vadd.f32 %v1572_v19, %v1521_v22 }
 0x234   :  { %v1592_v23 = vpop.f32.mrb[8].mxu1 }
 0x235   :  { %v1593_v24 = vpop.f32.mrb[9].mxu1 }
 0x236   :  { %v1594_v26 = vadd.f32 %v1593_v24, %v1592_v23  ;;  %v1595_v27 = vpop.f32.mrb[10].mxu1 }
 0x237   :  { %v1596_v28 = vpop.f32.mrb[11].mxu1 }
 0x238   :  { %v1374_v29 = vadd.f32 %v1594_v26, %v1334_v25 }
 0x23a   :  { %1380 = vst.msk [vmem:[%s2386_s6] sm:$0xff] %vm1379_vm0, %v1374_v29 }

</bundles_post_ra>
